<compile_context>
chip_gen: v6e
topology: v6e:2x2x1
jax: 0.10.0
libtpu: 0.0.40
codegen_flags: <defaults>
</compile_context>

<pallas_src>
import math
import functools

import jax
import jax.numpy as jnp
from jax import lax
from jax.experimental import pallas as pl
from jax.experimental.pallas import tpu as pltpu


# ---------------------------------------------------------------------------
# Kernel: one (batch, q-tile, head-group) grid step
# ---------------------------------------------------------------------------

def _mha_kernel(q_ref, k_ref, v_ref, wq_ref, wk_ref, wv_ref, wo_ref, bo_ref,
                o_ref, acc_ref, ctx_ref, *, heads_per_group, head_dim, scale):
    """Shapes (per grid step):
      q_ref  : (1, Tq, E)    query slab for this batch / q-tile
      k_ref  : (1, S,  E)    keys slab for this batch
      v_ref  : (1, S,  E)    values slab for this batch
      wq/wk/wv_ref : (E, Gw) this head-group's projection columns (x @ W form)
      wo_ref : (Gw, E)       this head-group's rows of the output projection
      bo_ref : (1, E)        output bias
      o_ref  : (1, Tq, E)    output slab (revisited across head groups)
      acc_ref: (Tq, E)  f32  VMEM output accumulator
      ctx_ref: (Tq, Gw) f32  VMEM per-group context buffer
    """
    hg = pl.program_id(2)
    tq, e = acc_ref.shape
    mxu = jnp.bfloat16

    # Initialize the output accumulator with the bias once per (batch, q-tile).
    @pl.when(hg == 0)
    def _():
        acc_ref[...] = jnp.broadcast_to(bo_ref[...], (tq, e)).astype(jnp.float32)

    xq = q_ref[0]                      # (Tq, E)
    xk = k_ref[0]                      # (S,  E)
    xv = v_ref[0]                      # (S,  E)

    # Head-group projections: full-E contraction depth, Gw-wide output.
    # The score scale is folded into q (Tq*Gw multiplies instead of Tq*S/head).
    q = jnp.dot(xq.astype(mxu), wq_ref[...].astype(mxu),
                preferred_element_type=jnp.float32) * scale        # (Tq, Gw)
    k = jnp.dot(xk.astype(mxu), wk_ref[...].astype(mxu),
                preferred_element_type=jnp.float32)                # (S, Gw)
    v = jnp.dot(xv.astype(mxu), wv_ref[...].astype(mxu),
                preferred_element_type=jnp.float32)                # (S, Gw)

    qb = q.astype(mxu)
    kb = k.astype(mxu)
    vb = v.astype(mxu)

    contract_last = (((1,), (1,)), ((), ()))   # q_h @ k_h^T without explicit .T

    for g in range(heads_per_group):           # static unroll within the group
        lo = g * head_dim
        hi = lo + head_dim
        sc = lax.dot_general(qb[:, lo:hi], kb[:, lo:hi], contract_last,
                             preferred_element_type=jnp.float32)   # (Tq, S)
        m = jnp.max(sc, axis=-1, keepdims=True)
        p = jnp.exp(sc - m)                                        # f32 softmax math
        l = jnp.sum(p, axis=-1, keepdims=True)
        ctx = jnp.dot(p.astype(mxu), vb[:, lo:hi],
                      preferred_element_type=jnp.float32)          # (Tq, Dh)
        # Deferred softmax normalization: scale (Tq, Dh) context, not (Tq, S) p.
        ctx_ref[:, lo:hi] = ctx * pl.reciprocal(l, approx=True)

    # Head merge + output projection for this group: one Gw-deep matmul
    # accumulated into the lane-dense (Tq, E) f32 scratch.
    acc_ref[...] += jnp.dot(ctx_ref[...].astype(mxu), wo_ref[...].astype(mxu),
                            preferred_element_type=jnp.float32)

    @pl.when(hg == pl.num_programs(2) - 1)
    def _():
        o_ref[0] = acc_ref[...].astype(o_ref.dtype)


# ---------------------------------------------------------------------------
# Tiling heuristics
# ---------------------------------------------------------------------------

def _pick_heads_per_group(num_heads, head_dim, e):
    """Heads per grid step so the group width (g*head_dim) is lane-aligned
    (multiple of 128, preferring >=256 for MXU contraction depth) or equals
    the full embedding dim (always a legal block)."""
    candidates = [g for g in range(1, num_heads + 1)
                  if num_heads % g == 0
                  and ((g * head_dim) % 128 == 0 or g * head_dim == e)]
    if not candidates:
        return num_heads                    # single group, block == full dim
    for g in candidates:
        if g * head_dim >= 256:
            return g
    return candidates[-1]


def _pick_q_tile(s):
    for tq in (512, 256, 128, 64, 32, 16, 8):
        if s % tq == 0:
            return tq
    return s


# ---------------------------------------------------------------------------
# Wrapper
# ---------------------------------------------------------------------------

def multi_head_attention_layer(params, query, keys, values, num_heads):
    """Forward pass matching the PyTorch MultiHeadAttentionLayer."""
    b, s, e = query.shape
    assert e % num_heads == 0, "embedding_dim must be divisible by num_heads"
    dh = e // num_heads
    # NOTE: the PyTorch source scales scores by 1/sqrt(embedding_dim),
    # not 1/sqrt(head_dim) — reproduced on purpose.
    scale = 1.0 / math.sqrt(e)

    heads_per_group = _pick_heads_per_group(num_heads, dh, e)
    num_groups = num_heads // heads_per_group
    gw = heads_per_group * dh
    tq = _pick_q_tile(s)
    num_q_tiles = s // tq

    # nn.Linear stores W as (out, in); transpose once so the kernel does x @ W.
    wq = params["w_q"].T
    wk = params["w_k"].T
    wv = params["w_v"].T
    wo = params["w_o"].T
    bo = params["b_o"].reshape(1, e)

    kernel = functools.partial(_mha_kernel, heads_per_group=heads_per_group,
                               head_dim=dh, scale=scale)

    grid = (b, num_q_tiles, num_groups)

    q_spec = pl.BlockSpec((1, tq, e), lambda bi, qi, hg: (bi, qi, 0))
    kv_spec = pl.BlockSpec((1, s, e), lambda bi, qi, hg: (bi, 0, 0))
    w_in_spec = pl.BlockSpec((e, gw), lambda bi, qi, hg: (0, hg))
    w_out_spec = pl.BlockSpec((gw, e), lambda bi, qi, hg: (hg, 0))
    b_spec = pl.BlockSpec((1, e), lambda bi, qi, hg: (0, 0))
    out_spec = pl.BlockSpec((1, tq, e), lambda bi, qi, hg: (bi, qi, 0))

    # Advisory cost estimate (Q proj + per-q-tile K/V projs + QK^T/PV + out proj).
    flops = b * (2 * s * e * e * (1 + 2 * num_q_tiles)
                 + 4 * s * s * e
                 + 2 * s * e * e)
    transcendentals = b * num_heads * s * s
    bytes_accessed = (4 * b * s * e + 4 * e * e + e) * 4

    return pl.pallas_call(
        kernel,
        out_shape=jax.ShapeDtypeStruct((b, s, e), query.dtype),
        grid=grid,
        in_specs=[q_spec, kv_spec, kv_spec, w_in_spec, w_in_spec, w_in_spec,
                  w_out_spec, b_spec],
        out_specs=out_spec,
        scratch_shapes=[pltpu.VMEM((tq, e), jnp.float32),
                        pltpu.VMEM((tq, gw), jnp.float32)],
        compiler_params=pltpu.CompilerParams(
            dimension_semantics=("parallel", "parallel", "arbitrary"),
            vmem_limit_bytes=64 * 1024 * 1024),
        cost_estimate=pl.CostEstimate(flops=flops,
                                      transcendentals=transcendentals,
                                      bytes_accessed=bytes_accessed),
    )(query, keys, values, wq, wk, wv, wo, bo)


# ---------------------------------------------------------------------------
# Pure-JAX reference (matches the PyTorch module in f32)
# ---------------------------------------------------------------------------

def _reference(params, query, keys, values, num_heads):
    b, s, e = query.shape
    dh = e // num_heads

    def proj_split(x, w):
        y = x @ w.T
        y = y.reshape(b, s, num_heads, dh).transpose(0, 2, 1, 3)
        return y.reshape(b * num_heads, s, dh)

    q = proj_split(query, params["w_q"])
    k = proj_split(keys, params["w_k"])
    v = proj_split(values, params["w_v"])
    sc = jnp.einsum("bqd,bkd->bqk", q, k) / math.sqrt(e)
    p = jax.nn.softmax(sc, axis=-1)
    o = jnp.einsum("bqk,bkd->bqd", p, v)
    o = o.reshape(b, num_heads, s, dh).transpose(0, 2, 1, 3).reshape(b, s, e)
    return o @ params["w_o"].T + params["b_o"]


# ---------------------------------------------------------------------------
# Main
# ---------------------------------------------------------------------------

if __name__ == "__main__":
    B, S, E, H = 2, 8, 32, 8  # batch, seq, embedding_dim, num_heads

    key = jax.random.PRNGKey(0)
    kq, kk, kv, kwq, kwk, kwv, kwo, kbo = jax.random.split(key, 8)

    bound = 1.0 / math.sqrt(E)
    params = {
        "w_q": jax.random.uniform(kwq, (E, E), jnp.float32, -bound, bound),
        "w_k": jax.random.uniform(kwk, (E, E), jnp.float32, -bound, bound),
        "w_v": jax.random.uniform(kwv, (E, E), jnp.float32, -bound, bound),
        "w_o": jax.random.uniform(kwo, (E, E), jnp.float32, -bound, bound),
        "b_o": jax.random.uniform(kbo, (E,), jnp.float32, -bound, bound),
    }

    query = jax.random.normal(kq, (B, S, E), jnp.float32)
    keys = jax.random.normal(kk, (B, S, E), jnp.float32)
    values = jax.random.normal(kv, (B, S, E), jnp.float32)

    out = multi_head_attention_layer(params, query, keys, values, H)
    out = jax.block_until_ready(out)

    ref = _reference(params, query, keys, values, H)
    assert out.shape == (B, S, E)
    # bf16 MXU operands + approx softmax reciprocal -> looser tolerance than f32.
    assert jnp.allclose(out, ref, atol=3e-2, rtol=3e-2), "mismatch vs reference"

    print("KERNEL_OK")
</pallas_src>

<mosaic_0001>
module attributes {stable_mosaic.version = 11 : i64} {
  func.func @_mha_kernel(%arg0: i32, %arg1: i32, %arg2: i32, %arg3: memref<1x8x32xf32, #tpu.memory_space<vmem>>, %arg4: memref<1x8x32xf32, #tpu.memory_space<vmem>>, %arg5: memref<1x8x32xf32, #tpu.memory_space<vmem>>, %arg6: memref<32x32xf32, #tpu.memory_space<vmem>>, %arg7: memref<32x32xf32, #tpu.memory_space<vmem>>, %arg8: memref<32x32xf32, #tpu.memory_space<vmem>>, %arg9: memref<32x32xf32, #tpu.memory_space<vmem>>, %arg10: memref<1x32xf32, #tpu.memory_space<vmem>>, %arg11: memref<1x8x32xf32, #tpu.memory_space<vmem>>, %arg12: memref<8x32xf32, #tpu.memory_space<vmem>>, %arg13: memref<8x32xf32, #tpu.memory_space<vmem>>) attributes {dimension_semantics = [#tpu.dimension_semantics<parallel>, #tpu.dimension_semantics<parallel>, #tpu.dimension_semantics<arbitrary>], iteration_bounds = array<i64: 2, 1, 1>, scalar_prefetch = 0 : i64, scratch_operands = 2 : i64, tpu.core_type = #tpu.core_type<tc>, window_params = [{transform_indices = @transform_0, window_bounds = array<i64: 1, 8, 32>}, {transform_indices = @transform_1, window_bounds = array<i64: 1, 8, 32>}, {transform_indices = @transform_2, window_bounds = array<i64: 1, 8, 32>}, {transform_indices = @transform_3, window_bounds = array<i64: 32, 32>}, {transform_indices = @transform_4, window_bounds = array<i64: 32, 32>}, {transform_indices = @transform_5, window_bounds = array<i64: 32, 32>}, {transform_indices = @transform_6, window_bounds = array<i64: 32, 32>}, {pipeline_mode = #tpu.pipeline_mode<synchronous>, transform_indices = @transform_7, window_bounds = array<i64: 1, 32>}, {transform_indices = @transform_8, window_bounds = array<i64: 1, 8, 32>}]} {
    %c0_i32 = arith.constant 0 : i32
    %0 = arith.cmpi eq, %arg2, %c0_i32 : i32
    %1 = arith.extui %0 : i1 to i32
    %c0_i32_0 = arith.constant 0 : i32
    %2 = arith.cmpi ne, %1, %c0_i32_0 : i32
    scf.if %2 {
      %c0_70 = arith.constant 0 : index
      %c0_71 = arith.constant 0 : index
      %173 = vector.load %arg10[%c0_70, %c0_71] : memref<1x32xf32, #tpu.memory_space<vmem>>, vector<1x32xf32>
      %174 = vector.shape_cast %173 : vector<1x32xf32> to vector<1x32xf32>
      %175 = vector.broadcast %174 : vector<1x32xf32> to vector<8x32xf32>
      %c0_72 = arith.constant 0 : index
      %c0_73 = arith.constant 0 : index
      %176 = vector.load %arg12[%c0_72, %c0_73] : memref<8x32xf32, #tpu.memory_space<vmem>>, vector<8x32xf32>
      tpu.vector_store %arg12[%c0_72, %c0_73], %175 {strides = array<i32>} : memref<8x32xf32, #tpu.memory_space<vmem>>, vector<8x32xf32>,
    } else {
    }
    %c0 = arith.constant 0 : index
    %c0_1 = arith.constant 0 : index
    %c0_2 = arith.constant 0 : index
    %3 = vector.load %arg3[%c0, %c0_1, %c0_2] : memref<1x8x32xf32, #tpu.memory_space<vmem>>, vector<1x8x32xf32>
    %4 = vector.shape_cast %3 : vector<1x8x32xf32> to vector<8x32xf32>
    %c0_3 = arith.constant 0 : index
    %c0_4 = arith.constant 0 : index
    %c0_5 = arith.constant 0 : index
    %5 = vector.load %arg4[%c0_3, %c0_4, %c0_5] : memref<1x8x32xf32, #tpu.memory_space<vmem>>, vector<1x8x32xf32>
    %6 = vector.shape_cast %5 : vector<1x8x32xf32> to vector<8x32xf32>
    %c0_6 = arith.constant 0 : index
    %c0_7 = arith.constant 0 : index
    %c0_8 = arith.constant 0 : index
    %7 = vector.load %arg5[%c0_6, %c0_7, %c0_8] : memref<1x8x32xf32, #tpu.memory_space<vmem>>, vector<1x8x32xf32>
    %8 = vector.shape_cast %7 : vector<1x8x32xf32> to vector<8x32xf32>
    %9 = arith.truncf %4 : vector<8x32xf32> to vector<8x32xbf16>
    %c0_9 = arith.constant 0 : index
    %c0_10 = arith.constant 0 : index
    %10 = vector.load %arg6[%c0_9, %c0_10] : memref<32x32xf32, #tpu.memory_space<vmem>>, vector<32x32xf32>
    %11 = arith.truncf %10 : vector<32x32xf32> to vector<32x32xbf16>
    %cst = arith.constant dense<0.000000e+00> : vector<8x32xf32>
    %12 = tpu.matmul %9, %11, %cst {dimension_numbers = #tpu.dot_dimension_numbers<[1], [0], [0], [1], [0, 0, 1, 1], [], []>} : vector<8x32xbf16>, vector<32x32xbf16>, vector<8x32xf32> -> vector<8x32xf32>
    %cst_11 = arith.constant 0.176776692 : f32
    %13 = vector.broadcast %cst_11 : f32 to vector<8x32xf32>
    %14 = arith.mulf %12, %13 : vector<8x32xf32>
    %15 = arith.truncf %6 : vector<8x32xf32> to vector<8x32xbf16>
    %c0_12 = arith.constant 0 : index
    %c0_13 = arith.constant 0 : index
    %16 = vector.load %arg7[%c0_12, %c0_13] : memref<32x32xf32, #tpu.memory_space<vmem>>, vector<32x32xf32>
    %17 = arith.truncf %16 : vector<32x32xf32> to vector<32x32xbf16>
    %cst_14 = arith.constant dense<0.000000e+00> : vector<8x32xf32>
    %18 = tpu.matmul %15, %17, %cst_14 {dimension_numbers = #tpu.dot_dimension_numbers<[1], [0], [0], [1], [0, 0, 1, 1], [], []>} : vector<8x32xbf16>, vector<32x32xbf16>, vector<8x32xf32> -> vector<8x32xf32>
    %19 = arith.truncf %8 : vector<8x32xf32> to vector<8x32xbf16>
    %c0_15 = arith.constant 0 : index
    %c0_16 = arith.constant 0 : index
    %20 = vector.load %arg8[%c0_15, %c0_16] : memref<32x32xf32, #tpu.memory_space<vmem>>, vector<32x32xf32>
    %21 = arith.truncf %20 : vector<32x32xf32> to vector<32x32xbf16>
    %cst_17 = arith.constant dense<0.000000e+00> : vector<8x32xf32>
    %22 = tpu.matmul %19, %21, %cst_17 {dimension_numbers = #tpu.dot_dimension_numbers<[1], [0], [0], [1], [0, 0, 1, 1], [], []>} : vector<8x32xbf16>, vector<32x32xbf16>, vector<8x32xf32> -> vector<8x32xf32>
    %23 = arith.truncf %14 : vector<8x32xf32> to vector<8x32xbf16>
    %24 = arith.truncf %18 : vector<8x32xf32> to vector<8x32xbf16>
    %25 = arith.truncf %22 : vector<8x32xf32> to vector<8x32xbf16>
    %26 = vector.extract_strided_slice %23 {offsets = [0, 0], sizes = [8, 4], strides = [1, 1]} : vector<8x32xbf16> to vector<8x4xbf16>
    %27 = vector.extract_strided_slice %24 {offsets = [0, 0], sizes = [8, 4], strides = [1, 1]} : vector<8x32xbf16> to vector<8x4xbf16>
    %cst_18 = arith.constant dense<0.000000e+00> : vector<8x8xf32>
    %28 = tpu.matmul %26, %27, %cst_18 {dimension_numbers = #tpu.dot_dimension_numbers<[1], [1], [0], [0], [0, 0, 1, 0], [], []>} : vector<8x4xbf16>, vector<8x4xbf16>, vector<8x8xf32> -> vector<8x8xf32>
    %cst_19 = arith.constant dense<0xFF800000> : vector<8xf32>
    %29 = vector.multi_reduction <maximumf>, %28, %cst_19 [1] : vector<8x8xf32> to vector<8xf32>
    %30 = vector.shape_cast %29 : vector<8xf32> to vector<8x1xf32>
    %31 = vector.broadcast %30 : vector<8x1xf32> to vector<8x8xf32>
    %32 = arith.subf %28, %31 : vector<8x8xf32>
    %33 = math.exp %32 : vector<8x8xf32>
    %cst_20 = arith.constant dense<0.000000e+00> : vector<8xf32>
    %34 = vector.multi_reduction <add>, %33, %cst_20 [1] : vector<8x8xf32> to vector<8xf32>
    %35 = vector.shape_cast %34 : vector<8xf32> to vector<8x1xf32>
    %36 = arith.truncf %33 : vector<8x8xf32> to vector<8x8xbf16>
    %37 = vector.extract_strided_slice %25 {offsets = [0, 0], sizes = [8, 4], strides = [1, 1]} : vector<8x32xbf16> to vector<8x4xbf16>
    %cst_21 = arith.constant dense<0.000000e+00> : vector<8x4xf32>
    %38 = tpu.matmul %36, %37, %cst_21 {dimension_numbers = #tpu.dot_dimension_numbers<[1], [0], [0], [1], [0, 0, 1, 1], [], []>} : vector<8x8xbf16>, vector<8x4xbf16>, vector<8x4xf32> -> vector<8x4xf32>
    %39 = tpu.reciprocal %35 {approx = true} : vector<8x1xf32> -> vector<8x1xf32>
    %40 = vector.broadcast %39 : vector<8x1xf32> to vector<8x4xf32>
    %41 = arith.mulf %38, %40 : vector<8x4xf32>
    %c0_22 = arith.constant 0 : index
    %c0_23 = arith.constant 0 : index
    %42 = vector.load %arg13[%c0_22, %c0_23] : memref<8x32xf32, #tpu.memory_space<vmem>>, vector<8x4xf32>
    tpu.vector_store %arg13[%c0_22, %c0_23], %41 {strides = array<i32>} : memref<8x32xf32, #tpu.memory_space<vmem>>, vector<8x4xf32>,
    %43 = vector.extract_strided_slice %23 {offsets = [0, 4], sizes = [8, 4], strides = [1, 1]} : vector<8x32xbf16> to vector<8x4xbf16>
    %44 = vector.extract_strided_slice %24 {offsets = [0, 4], sizes = [8, 4], strides = [1, 1]} : vector<8x32xbf16> to vector<8x4xbf16>
    %cst_24 = arith.constant dense<0.000000e+00> : vector<8x8xf32>
    %45 = tpu.matmul %43, %44, %cst_24 {dimension_numbers = #tpu.dot_dimension_numbers<[1], [1], [0], [0], [0, 0, 1, 0], [], []>} : vector<8x4xbf16>, vector<8x4xbf16>, vector<8x8xf32> -> vector<8x8xf32>
    %cst_25 = arith.constant dense<0xFF800000> : vector<8xf32>
    %46 = vector.multi_reduction <maximumf>, %45, %cst_25 [1] : vector<8x8xf32> to vector<8xf32>
    %47 = vector.shape_cast %46 : vector<8xf32> to vector<8x1xf32>
    %48 = vector.broadcast %47 : vector<8x1xf32> to vector<8x8xf32>
    %49 = arith.subf %45, %48 : vector<8x8xf32>
    %50 = math.exp %49 : vector<8x8xf32>
    %cst_26 = arith.constant dense<0.000000e+00> : vector<8xf32>
    %51 = vector.multi_reduction <add>, %50, %cst_26 [1] : vector<8x8xf32> to vector<8xf32>
    %52 = vector.shape_cast %51 : vector<8xf32> to vector<8x1xf32>
    %53 = arith.truncf %50 : vector<8x8xf32> to vector<8x8xbf16>
    %54 = vector.extract_strided_slice %25 {offsets = [0, 4], sizes = [8, 4], strides = [1, 1]} : vector<8x32xbf16> to vector<8x4xbf16>
    %cst_27 = arith.constant dense<0.000000e+00> : vector<8x4xf32>
    %55 = tpu.matmul %53, %54, %cst_27 {dimension_numbers = #tpu.dot_dimension_numbers<[1], [0], [0], [1], [0, 0, 1, 1], [], []>} : vector<8x8xbf16>, vector<8x4xbf16>, vector<8x4xf32> -> vector<8x4xf32>
    %56 = tpu.reciprocal %52 {approx = true} : vector<8x1xf32> -> vector<8x1xf32>
    %57 = vector.broadcast %56 : vector<8x1xf32> to vector<8x4xf32>
    %58 = arith.mulf %55, %57 : vector<8x4xf32>
    %c0_28 = arith.constant 0 : index
    %c4 = arith.constant 4 : index
    %59 = vector.load %arg13[%c0_28, %c4] : memref<8x32xf32, #tpu.memory_space<vmem>>, vector<8x4xf32>
    tpu.vector_store %arg13[%c0_28, %c4], %58 {strides = array<i32>} : memref<8x32xf32, #tpu.memory_space<vmem>>, vector<8x4xf32>,
    %60 = vector.extract_strided_slice %23 {offsets = [0, 8], sizes = [8, 4], strides = [1, 1]} : vector<8x32xbf16> to vector<8x4xbf16>
    %61 = vector.extract_strided_slice %24 {offsets = [0, 8], sizes = [8, 4], strides = [1, 1]} : vector<8x32xbf16> to vector<8x4xbf16>
    %cst_29 = arith.constant dense<0.000000e+00> : vector<8x8xf32>
    %62 = tpu.matmul %60, %61, %cst_29 {dimension_numbers = #tpu.dot_dimension_numbers<[1], [1], [0], [0], [0, 0, 1, 0], [], []>} : vector<8x4xbf16>, vector<8x4xbf16>, vector<8x8xf32> -> vector<8x8xf32>
    %cst_30 = arith.constant dense<0xFF800000> : vector<8xf32>
    %63 = vector.multi_reduction <maximumf>, %62, %cst_30 [1] : vector<8x8xf32> to vector<8xf32>
    %64 = vector.shape_cast %63 : vector<8xf32> to vector<8x1xf32>
    %65 = vector.broadcast %64 : vector<8x1xf32> to vector<8x8xf32>
    %66 = arith.subf %62, %65 : vector<8x8xf32>
    %67 = math.exp %66 : vector<8x8xf32>
    %cst_31 = arith.constant dense<0.000000e+00> : vector<8xf32>
    %68 = vector.multi_reduction <add>, %67, %cst_31 [1] : vector<8x8xf32> to vector<8xf32>
    %69 = vector.shape_cast %68 : vector<8xf32> to vector<8x1xf32>
    %70 = arith.truncf %67 : vector<8x8xf32> to vector<8x8xbf16>
    %71 = vector.extract_strided_slice %25 {offsets = [0, 8], sizes = [8, 4], strides = [1, 1]} : vector<8x32xbf16> to vector<8x4xbf16>
    %cst_32 = arith.constant dense<0.000000e+00> : vector<8x4xf32>
    %72 = tpu.matmul %70, %71, %cst_32 {dimension_numbers = #tpu.dot_dimension_numbers<[1], [0], [0], [1], [0, 0, 1, 1], [], []>} : vector<8x8xbf16>, vector<8x4xbf16>, vector<8x4xf32> -> vector<8x4xf32>
    %73 = tpu.reciprocal %69 {approx = true} : vector<8x1xf32> -> vector<8x1xf32>
    %74 = vector.broadcast %73 : vector<8x1xf32> to vector<8x4xf32>
    %75 = arith.mulf %72, %74 : vector<8x4xf32>
    %c0_33 = arith.constant 0 : index
    %c8 = arith.constant 8 : index
    %76 = vector.load %arg13[%c0_33, %c8] : memref<8x32xf32, #tpu.memory_space<vmem>>, vector<8x4xf32>
    tpu.vector_store %arg13[%c0_33, %c8], %75 {strides = array<i32>} : memref<8x32xf32, #tpu.memory_space<vmem>>, vector<8x4xf32>,
    %77 = vector.extract_strided_slice %23 {offsets = [0, 12], sizes = [8, 4], strides = [1, 1]} : vector<8x32xbf16> to vector<8x4xbf16>
    %78 = vector.extract_strided_slice %24 {offsets = [0, 12], sizes = [8, 4], strides = [1, 1]} : vector<8x32xbf16> to vector<8x4xbf16>
    %cst_34 = arith.constant dense<0.000000e+00> : vector<8x8xf32>
    %79 = tpu.matmul %77, %78, %cst_34 {dimension_numbers = #tpu.dot_dimension_numbers<[1], [1], [0], [0], [0, 0, 1, 0], [], []>} : vector<8x4xbf16>, vector<8x4xbf16>, vector<8x8xf32> -> vector<8x8xf32>
    %cst_35 = arith.constant dense<0xFF800000> : vector<8xf32>
    %80 = vector.multi_reduction <maximumf>, %79, %cst_35 [1] : vector<8x8xf32> to vector<8xf32>
    %81 = vector.shape_cast %80 : vector<8xf32> to vector<8x1xf32>
    %82 = vector.broadcast %81 : vector<8x1xf32> to vector<8x8xf32>
    %83 = arith.subf %79, %82 : vector<8x8xf32>
    %84 = math.exp %83 : vector<8x8xf32>
    %cst_36 = arith.constant dense<0.000000e+00> : vector<8xf32>
    %85 = vector.multi_reduction <add>, %84, %cst_36 [1] : vector<8x8xf32> to vector<8xf32>
    %86 = vector.shape_cast %85 : vector<8xf32> to vector<8x1xf32>
    %87 = arith.truncf %84 : vector<8x8xf32> to vector<8x8xbf16>
    %88 = vector.extract_strided_slice %25 {offsets = [0, 12], sizes = [8, 4], strides = [1, 1]} : vector<8x32xbf16> to vector<8x4xbf16>
    %cst_37 = arith.constant dense<0.000000e+00> : vector<8x4xf32>
    %89 = tpu.matmul %87, %88, %cst_37 {dimension_numbers = #tpu.dot_dimension_numbers<[1], [0], [0], [1], [0, 0, 1, 1], [], []>} : vector<8x8xbf16>, vector<8x4xbf16>, vector<8x4xf32> -> vector<8x4xf32>
    %90 = tpu.reciprocal %86 {approx = true} : vector<8x1xf32> -> vector<8x1xf32>
    %91 = vector.broadcast %90 : vector<8x1xf32> to vector<8x4xf32>
    %92 = arith.mulf %89, %91 : vector<8x4xf32>
    %c0_38 = arith.constant 0 : index
    %c12 = arith.constant 12 : index
    %93 = vector.load %arg13[%c0_38, %c12] : memref<8x32xf32, #tpu.memory_space<vmem>>, vector<8x4xf32>
    tpu.vector_store %arg13[%c0_38, %c12], %92 {strides = array<i32>} : memref<8x32xf32, #tpu.memory_space<vmem>>, vector<8x4xf32>,
    %94 = vector.extract_strided_slice %23 {offsets = [0, 16], sizes = [8, 4], strides = [1, 1]} : vector<8x32xbf16> to vector<8x4xbf16>
    %95 = vector.extract_strided_slice %24 {offsets = [0, 16], sizes = [8, 4], strides = [1, 1]} : vector<8x32xbf16> to vector<8x4xbf16>
    %cst_39 = arith.constant dense<0.000000e+00> : vector<8x8xf32>
    %96 = tpu.matmul %94, %95, %cst_39 {dimension_numbers = #tpu.dot_dimension_numbers<[1], [1], [0], [0], [0, 0, 1, 0], [], []>} : vector<8x4xbf16>, vector<8x4xbf16>, vector<8x8xf32> -> vector<8x8xf32>
    %cst_40 = arith.constant dense<0xFF800000> : vector<8xf32>
    %97 = vector.multi_reduction <maximumf>, %96, %cst_40 [1] : vector<8x8xf32> to vector<8xf32>
    %98 = vector.shape_cast %97 : vector<8xf32> to vector<8x1xf32>
    %99 = vector.broadcast %98 : vector<8x1xf32> to vector<8x8xf32>
    %100 = arith.subf %96, %99 : vector<8x8xf32>
    %101 = math.exp %100 : vector<8x8xf32>
    %cst_41 = arith.constant dense<0.000000e+00> : vector<8xf32>
    %102 = vector.multi_reduction <add>, %101, %cst_41 [1] : vector<8x8xf32> to vector<8xf32>
    %103 = vector.shape_cast %102 : vector<8xf32> to vector<8x1xf32>
    %104 = arith.truncf %101 : vector<8x8xf32> to vector<8x8xbf16>
    %105 = vector.extract_strided_slice %25 {offsets = [0, 16], sizes = [8, 4], strides = [1, 1]} : vector<8x32xbf16> to vector<8x4xbf16>
    %cst_42 = arith.constant dense<0.000000e+00> : vector<8x4xf32>
    %106 = tpu.matmul %104, %105, %cst_42 {dimension_numbers = #tpu.dot_dimension_numbers<[1], [0], [0], [1], [0, 0, 1, 1], [], []>} : vector<8x8xbf16>, vector<8x4xbf16>, vector<8x4xf32> -> vector<8x4xf32>
    %107 = tpu.reciprocal %103 {approx = true} : vector<8x1xf32> -> vector<8x1xf32>
    %108 = vector.broadcast %107 : vector<8x1xf32> to vector<8x4xf32>
    %109 = arith.mulf %106, %108 : vector<8x4xf32>
    %c0_43 = arith.constant 0 : index
    %c16 = arith.constant 16 : index
    %110 = vector.load %arg13[%c0_43, %c16] : memref<8x32xf32, #tpu.memory_space<vmem>>, vector<8x4xf32>
    tpu.vector_store %arg13[%c0_43, %c16], %109 {strides = array<i32>} : memref<8x32xf32, #tpu.memory_space<vmem>>, vector<8x4xf32>,
    %111 = vector.extract_strided_slice %23 {offsets = [0, 20], sizes = [8, 4], strides = [1, 1]} : vector<8x32xbf16> to vector<8x4xbf16>
    %112 = vector.extract_strided_slice %24 {offsets = [0, 20], sizes = [8, 4], strides = [1, 1]} : vector<8x32xbf16> to vector<8x4xbf16>
    %cst_44 = arith.constant dense<0.000000e+00> : vector<8x8xf32>
    %113 = tpu.matmul %111, %112, %cst_44 {dimension_numbers = #tpu.dot_dimension_numbers<[1], [1], [0], [0], [0, 0, 1, 0], [], []>} : vector<8x4xbf16>, vector<8x4xbf16>, vector<8x8xf32> -> vector<8x8xf32>
    %cst_45 = arith.constant dense<0xFF800000> : vector<8xf32>
    %114 = vector.multi_reduction <maximumf>, %113, %cst_45 [1] : vector<8x8xf32> to vector<8xf32>
    %115 = vector.shape_cast %114 : vector<8xf32> to vector<8x1xf32>
    %116 = vector.broadcast %115 : vector<8x1xf32> to vector<8x8xf32>
    %117 = arith.subf %113, %116 : vector<8x8xf32>
    %118 = math.exp %117 : vector<8x8xf32>
    %cst_46 = arith.constant dense<0.000000e+00> : vector<8xf32>
    %119 = vector.multi_reduction <add>, %118, %cst_46 [1] : vector<8x8xf32> to vector<8xf32>
    %120 = vector.shape_cast %119 : vector<8xf32> to vector<8x1xf32>
    %121 = arith.truncf %118 : vector<8x8xf32> to vector<8x8xbf16>
    %122 = vector.extract_strided_slice %25 {offsets = [0, 20], sizes = [8, 4], strides = [1, 1]} : vector<8x32xbf16> to vector<8x4xbf16>
    %cst_47 = arith.constant dense<0.000000e+00> : vector<8x4xf32>
    %123 = tpu.matmul %121, %122, %cst_47 {dimension_numbers = #tpu.dot_dimension_numbers<[1], [0], [0], [1], [0, 0, 1, 1], [], []>} : vector<8x8xbf16>, vector<8x4xbf16>, vector<8x4xf32> -> vector<8x4xf32>
    %124 = tpu.reciprocal %120 {approx = true} : vector<8x1xf32> -> vector<8x1xf32>
    %125 = vector.broadcast %124 : vector<8x1xf32> to vector<8x4xf32>
    %126 = arith.mulf %123, %125 : vector<8x4xf32>
    %c0_48 = arith.constant 0 : index
    %c20 = arith.constant 20 : index
    %127 = vector.load %arg13[%c0_48, %c20] : memref<8x32xf32, #tpu.memory_space<vmem>>, vector<8x4xf32>
    tpu.vector_store %arg13[%c0_48, %c20], %126 {strides = array<i32>} : memref<8x32xf32, #tpu.memory_space<vmem>>, vector<8x4xf32>,
    %128 = vector.extract_strided_slice %23 {offsets = [0, 24], sizes = [8, 4], strides = [1, 1]} : vector<8x32xbf16> to vector<8x4xbf16>
    %129 = vector.extract_strided_slice %24 {offsets = [0, 24], sizes = [8, 4], strides = [1, 1]} : vector<8x32xbf16> to vector<8x4xbf16>
    %cst_49 = arith.constant dense<0.000000e+00> : vector<8x8xf32>
    %130 = tpu.matmul %128, %129, %cst_49 {dimension_numbers = #tpu.dot_dimension_numbers<[1], [1], [0], [0], [0, 0, 1, 0], [], []>} : vector<8x4xbf16>, vector<8x4xbf16>, vector<8x8xf32> -> vector<8x8xf32>
    %cst_50 = arith.constant dense<0xFF800000> : vector<8xf32>
    %131 = vector.multi_reduction <maximumf>, %130, %cst_50 [1] : vector<8x8xf32> to vector<8xf32>
    %132 = vector.shape_cast %131 : vector<8xf32> to vector<8x1xf32>
    %133 = vector.broadcast %132 : vector<8x1xf32> to vector<8x8xf32>
    %134 = arith.subf %130, %133 : vector<8x8xf32>
    %135 = math.exp %134 : vector<8x8xf32>
    %cst_51 = arith.constant dense<0.000000e+00> : vector<8xf32>
    %136 = vector.multi_reduction <add>, %135, %cst_51 [1] : vector<8x8xf32> to vector<8xf32>
    %137 = vector.shape_cast %136 : vector<8xf32> to vector<8x1xf32>
    %138 = arith.truncf %135 : vector<8x8xf32> to vector<8x8xbf16>
    %139 = vector.extract_strided_slice %25 {offsets = [0, 24], sizes = [8, 4], strides = [1, 1]} : vector<8x32xbf16> to vector<8x4xbf16>
    %cst_52 = arith.constant dense<0.000000e+00> : vector<8x4xf32>
    %140 = tpu.matmul %138, %139, %cst_52 {dimension_numbers = #tpu.dot_dimension_numbers<[1], [0], [0], [1], [0, 0, 1, 1], [], []>} : vector<8x8xbf16>, vector<8x4xbf16>, vector<8x4xf32> -> vector<8x4xf32>
    %141 = tpu.reciprocal %137 {approx = true} : vector<8x1xf32> -> vector<8x1xf32>
    %142 = vector.broadcast %141 : vector<8x1xf32> to vector<8x4xf32>
    %143 = arith.mulf %140, %142 : vector<8x4xf32>
    %c0_53 = arith.constant 0 : index
    %c24 = arith.constant 24 : index
    %144 = vector.load %arg13[%c0_53, %c24] : memref<8x32xf32, #tpu.memory_space<vmem>>, vector<8x4xf32>
    tpu.vector_store %arg13[%c0_53, %c24], %143 {strides = array<i32>} : memref<8x32xf32, #tpu.memory_space<vmem>>, vector<8x4xf32>,
    %145 = vector.extract_strided_slice %23 {offsets = [0, 28], sizes = [8, 4], strides = [1, 1]} : vector<8x32xbf16> to vector<8x4xbf16>
    %146 = vector.extract_strided_slice %24 {offsets = [0, 28], sizes = [8, 4], strides = [1, 1]} : vector<8x32xbf16> to vector<8x4xbf16>
    %cst_54 = arith.constant dense<0.000000e+00> : vector<8x8xf32>
    %147 = tpu.matmul %145, %146, %cst_54 {dimension_numbers = #tpu.dot_dimension_numbers<[1], [1], [0], [0], [0, 0, 1, 0], [], []>} : vector<8x4xbf16>, vector<8x4xbf16>, vector<8x8xf32> -> vector<8x8xf32>
    %cst_55 = arith.constant dense<0xFF800000> : vector<8xf32>
    %148 = vector.multi_reduction <maximumf>, %147, %cst_55 [1] : vector<8x8xf32> to vector<8xf32>
    %149 = vector.shape_cast %148 : vector<8xf32> to vector<8x1xf32>
    %150 = vector.broadcast %149 : vector<8x1xf32> to vector<8x8xf32>
    %151 = arith.subf %147, %150 : vector<8x8xf32>
    %152 = math.exp %151 : vector<8x8xf32>
    %cst_56 = arith.constant dense<0.000000e+00> : vector<8xf32>
    %153 = vector.multi_reduction <add>, %152, %cst_56 [1] : vector<8x8xf32> to vector<8xf32>
    %154 = vector.shape_cast %153 : vector<8xf32> to vector<8x1xf32>
    %155 = arith.truncf %152 : vector<8x8xf32> to vector<8x8xbf16>
    %156 = vector.extract_strided_slice %25 {offsets = [0, 28], sizes = [8, 4], strides = [1, 1]} : vector<8x32xbf16> to vector<8x4xbf16>
    %cst_57 = arith.constant dense<0.000000e+00> : vector<8x4xf32>
    %157 = tpu.matmul %155, %156, %cst_57 {dimension_numbers = #tpu.dot_dimension_numbers<[1], [0], [0], [1], [0, 0, 1, 1], [], []>} : vector<8x8xbf16>, vector<8x4xbf16>, vector<8x4xf32> -> vector<8x4xf32>
    %158 = tpu.reciprocal %154 {approx = true} : vector<8x1xf32> -> vector<8x1xf32>
    %159 = vector.broadcast %158 : vector<8x1xf32> to vector<8x4xf32>
    %160 = arith.mulf %157, %159 : vector<8x4xf32>
    %c0_58 = arith.constant 0 : index
    %c28 = arith.constant 28 : index
    %161 = vector.load %arg13[%c0_58, %c28] : memref<8x32xf32, #tpu.memory_space<vmem>>, vector<8x4xf32>
    tpu.vector_store %arg13[%c0_58, %c28], %160 {strides = array<i32>} : memref<8x32xf32, #tpu.memory_space<vmem>>, vector<8x4xf32>,
    %c0_59 = arith.constant 0 : index
    %c0_60 = arith.constant 0 : index
    %162 = vector.load %arg12[%c0_59, %c0_60] : memref<8x32xf32, #tpu.memory_space<vmem>>, vector<8x32xf32>
    %c0_61 = arith.constant 0 : index
    %c0_62 = arith.constant 0 : index
    %163 = vector.load %arg13[%c0_61, %c0_62] : memref<8x32xf32, #tpu.memory_space<vmem>>, vector<8x32xf32>
    %164 = arith.truncf %163 : vector<8x32xf32> to vector<8x32xbf16>
    %c0_63 = arith.constant 0 : index
    %c0_64 = arith.constant 0 : index
    %165 = vector.load %arg9[%c0_63, %c0_64] : memref<32x32xf32, #tpu.memory_space<vmem>>, vector<32x32xf32>
    %166 = arith.truncf %165 : vector<32x32xf32> to vector<32x32xbf16>
    %cst_65 = arith.constant dense<0.000000e+00> : vector<8x32xf32>
    %167 = tpu.matmul %164, %166, %cst_65 {dimension_numbers = #tpu.dot_dimension_numbers<[1], [0], [0], [1], [0, 0, 1, 1], [], []>} : vector<8x32xbf16>, vector<32x32xbf16>, vector<8x32xf32> -> vector<8x32xf32>
    %168 = arith.addf %162, %167 : vector<8x32xf32>
    %c0_66 = arith.constant 0 : index
    %c0_67 = arith.constant 0 : index
    %169 = vector.load %arg12[%c0_66, %c0_67] : memref<8x32xf32, #tpu.memory_space<vmem>>, vector<8x32xf32>
    tpu.vector_store %arg12[%c0_66, %c0_67], %168 {strides = array<i32>} : memref<8x32xf32, #tpu.memory_space<vmem>>, vector<8x32xf32>,
    %c0_i32_68 = arith.constant 0 : i32
    %170 = arith.cmpi eq, %arg2, %c0_i32_68 : i32
    %171 = arith.extui %170 : i1 to i32
    %c0_i32_69 = arith.constant 0 : i32
    %172 = arith.cmpi ne, %171, %c0_i32_69 : i32
    scf.if %172 {
      %c0_70 = arith.constant 0 : index
      %c0_71 = arith.constant 0 : index
      %173 = vector.load %arg12[%c0_70, %c0_71] : memref<8x32xf32, #tpu.memory_space<vmem>>, vector<8x32xf32>
      %c0_72 = arith.constant 0 : index
      %c0_73 = arith.constant 0 : index
      %c0_74 = arith.constant 0 : index
      %174 = vector.load %arg11[%c0_72, %c0_73, %c0_74] : memref<1x8x32xf32, #tpu.memory_space<vmem>>, vector<1x8x32xf32>
      %175 = vector.shape_cast %174 : vector<1x8x32xf32> to vector<8x32xf32>
      %176 = vector.shape_cast %173 : vector<8x32xf32> to vector<1x8x32xf32>
      tpu.vector_store %arg11[%c0_72, %c0_73, %c0_74], %176 {strides = array<i32>} : memref<1x8x32xf32, #tpu.memory_space<vmem>>, vector<1x8x32xf32>,
    } else {
    }
    return
  }
  func.func @transform_0(%arg0: i32, %arg1: i32, %arg2: i32) -> (i32, i32, i32) {
    %c0_i32 = arith.constant 0 : i32
    %c0_i32_0 = arith.constant 0 : i32
    return %arg0, %arg1, %c0_i32 : i32, i32, i32
  }
  func.func @transform_1(%arg0: i32, %arg1: i32, %arg2: i32) -> (i32, i32, i32) {
    %c0_i32 = arith.constant 0 : i32
    %c0_i32_0 = arith.constant 0 : i32
    %c0_i32_1 = arith.constant 0 : i32
    return %arg0, %c0_i32, %c0_i32_0 : i32, i32, i32
  }
  func.func @transform_2(%arg0: i32, %arg1: i32, %arg2: i32) -> (i32, i32, i32) {
    %c0_i32 = arith.constant 0 : i32
    %c0_i32_0 = arith.constant 0 : i32
    %c0_i32_1 = arith.constant 0 : i32
    return %arg0, %c0_i32, %c0_i32_0 : i32, i32, i32
  }
  func.func @transform_3(%arg0: i32, %arg1: i32, %arg2: i32) -> (i32, i32) {
    %c0_i32 = arith.constant 0 : i32
    %c0_i32_0 = arith.constant 0 : i32
    return %c0_i32, %arg2 : i32, i32
  }
  func.func @transform_4(%arg0: i32, %arg1: i32, %arg2: i32) -> (i32, i32) {
    %c0_i32 = arith.constant 0 : i32
    %c0_i32_0 = arith.constant 0 : i32
    return %c0_i32, %arg2 : i32, i32
  }
  func.func @transform_5(%arg0: i32, %arg1: i32, %arg2: i32) -> (i32, i32) {
    %c0_i32 = arith.constant 0 : i32
    %c0_i32_0 = arith.constant 0 : i32
    return %c0_i32, %arg2 : i32, i32
  }
  func.func @transform_6(%arg0: i32, %arg1: i32, %arg2: i32) -> (i32, i32) {
    %c0_i32 = arith.constant 0 : i32
    %c0_i32_0 = arith.constant 0 : i32
    return %arg2, %c0_i32 : i32, i32
  }
  func.func @transform_7(%arg0: i32, %arg1: i32, %arg2: i32) -> (i32, i32) {
    %c0_i32 = arith.constant 0 : i32
    %c0_i32_0 = arith.constant 0 : i32
    %c0_i32_1 = arith.constant 0 : i32
    return %c0_i32, %c0_i32_0 : i32, i32
  }
  func.func @transform_8(%arg0: i32, %arg1: i32, %arg2: i32) -> (i32, i32, i32) {
    %c0_i32 = arith.constant 0 : i32
    %c0_i32_0 = arith.constant 0 : i32
    return %arg0, %arg1, %c0_i32 : i32, i32, i32
  }
}

</mosaic_0001>

<bundles_post_ra>
// kernel: tpu_custom_call.1
= control target key start
LH: loop header
LB: loop body
LE: loop exit
PB: predicated region body
PF: predicated region fallthrough
CT: control target
= control target key end

     0   :  { %s3024_s0 = inlined_call_operand.hbm [shape: f32[2,8,32], index: 0, kind: input, shape index: {}]   ;;  %s3025_s1 = inlined_call_operand.hbm [shape: f32[2,8,32], index: 1, kind: input, shape index: {}]   ;;  %s3026_s2 = inlined_call_operand.hbm [shape: f32[2,8,32], index: 2, kind: input, shape index: {}]   ;;  %s3027_s3 = inlined_call_operand.hbm [shape: f32[32,32], index: 3, kind: input, shape index: {}]   ;;  %s3028_s4 = inlined_call_operand.hbm [shape: f32[32,32], index: 4, kind: input, shape index: {}]   ;;  %s3029_s5 = inlined_call_operand.hbm [shape: f32[32,32], index: 5, kind: input, shape index: {}]   ;;  %s3030_s6 = inlined_call_operand.hbm [shape: f32[32,32], index: 6, kind: input, shape index: {}]   ;;  %s3031_s7 = inlined_call_operand.vmem [shape: f32[1,32], index: 7, kind: input, shape index: {}]   ;;  %s3032_s8 = inlined_call_operand.hbm [shape: f32[2,8,32], index: 8, kind: output, shape index: {}]  }
   0x1   :  { %3048 = sst [smem:[#allocation28_spill]] %s3025_s1 }
   0x2   :  { %3049 = sst [smem:[#allocation29_spill]] %s3027_s3 }
   0x3   :  { %3050 = sst [smem:[#allocation30_spill]] %s3028_s4 }
   0x4   :  { %3051 = sst [smem:[#allocation31_spill]] %s3029_s5 }
   0x5   :  { %13 = vsyncpa [#allocation5], 0 }
   0x6   :  { %15 = vsyncpa [#allocation5 + $0x1], 0 }
   0x7   :  { %16 = vsyncpa [#allocation8], 0 }
   0x8   :  { %18 = vsyncpa [#allocation8 + $0x1], 0 }
   0x9   :  { %19 = vsyncpa [#allocation11], 0 }
   0xa   :  { %20 = vsyncpa [#allocation14], 0 }
   0xb   :  { %21 = vsyncpa [#allocation6], 0 }
   0xc   :  { %23 = vsyncpa [#allocation6 + $0x1], 0  ;;  %s2581_s27 = smov 0   ;;  %s2583_s28 = smov 0  }
   0xd   :  { %s2585_s29 = smov 0   ;;  %s2587_s30 = smov 0  }
   0xe   :  { %s2589_s9 = smov 0   ;;  %s2591_s10 = smov 0  }
   0xf LB: > { %3052 = sst [smem:[#allocation22_spill]] %s2488_s27  ;;  %s2612_s11 = sadd.s32 4294967295, %s2508_s10   ;;  %s2508_s10 = sphi %s2591_s10, %s29_s10   ;;  %s2504_s9 = sphi %s2589_s9, %s3088_s9   ;;  %s2500_s30 = sphi %s2587_s30, %s3087_s30   ;;  %s2496_s29 = sphi %s2585_s29, %s3091_s29   ;;  %s2492_s28 = sphi %s2583_s28, %s3090_s28   ;;  %s2488_s27 = sphi %s2581_s27, %s3089_s27  }
  0x10   : > { %3053 = sst [smem:[#allocation23_spill]] %s2504_s9  ;;  %p1847_p0 = scmp.ge.s32.totalorder %s2508_s10, 1 }
  0x11   : > { %3054 = sst [smem:[#allocation24_spill]] %s2508_s10  ;;  %p3042_p1 = scmp.eq.s32.totalorder %s2612_s11, 0 }
  0x12   : > { %p286_p2 = scmp.lt.s32.totalorder %s2508_s10, 3  ;;  %s2510_s13 = smov [#allocation10]  }
  0x13   : > { %s300_s14 = sshll.u32 %s2510_s13, 4  ;;  %s2511_s16 = smov [#allocation13]   ;;  %s301_s14 = int_to_ptr.vmem [resolvable:$true] %s300_s14 }
  0x14   : > { %p2617_p3 = pnand %p1847_p0, %p286_p2  ;;  %s330_s17 = sshll.u32 %s2511_s16, 4  ;;  %s331_s17 = int_to_ptr.vmem [resolvable:$true] %s330_s17 }
  0x15   : > { %s2239_s18 = scalar_lea.vmem %s301_s14, 512  ;;  %p2247_p11 = scmp.lt.s32.totalorder %s301_s14, %s301_s14 }
  0x16   : > { %p2089_p4 = pneg %p2617_p3  ;;  %p2240_p8 = scmp.ne.s32.totalorder %s301_s14, %s2239_s18 }
  0x17   : > { %p2248_p12 = scmp.lt.s32.totalorder %s2239_s18, %s2239_s18 }
  0x18   : > { %p2626_p6 = pnand %p2089_p4, %p3042_p1 }
  0x19   : > { %p2249_p13 = por %p2248_p12, %p2247_p11 }
  0x1a   : > { %p3043_p7 = pneg %p2626_p6 }
  0x1c   : > { %p2242_p9 = pnand %p2240_p8, %p3043_p7 }
  0x1e   : > { %p2243_p10 = pneg %p2242_p9 }
  0x20   : > { %p2250_p0 = pnand %p2249_p13, %p2243_p10 }
  0x22   : > { %2253 = shalt.err (!%p2250_p0)
}
  0x23   : > { %s3033_s19 = smov 128   ;;  %s3035_s20 = smov 8  }
  0x24   : > { %s3057_s3 = sld [smem:[#allocation29_spill]]  ;;  %s2265_s23 = scalar_lea.vmem %s331_s17, 512 }
  0x25   : > { %p2266_p2 = scmp.ne.s32.totalorder %s331_s17, %s2265_s23  ;;  %p2273_p9 = scmp.lt.s32.totalorder %s331_s17, %s331_s17 }
  0x26   : > { %p2274_p10 = scmp.lt.s32.totalorder %s2265_s23, %s2265_s23 }
  0x27   : > { %p2268_p4 = pnand %p2266_p2, %p3043_p7 }
  0x28   : > { %p2275_p11 = por %p2274_p10, %p2273_p9 }
  0x29   : > { %p2269_p8 = pneg %p2268_p4 }
  0x2a   : > { %2092 = dma.hbm_to_vmem [thread:$0]  (!%p2626_p6), %s3057_s3, 512, %s301_s14, [#allocation11], %s3033_s19, %s3033_s19, %s3035_s20  }
  0x2b   : > { %p2276_p12 = pnand %p2275_p11, %p2269_p8 }
  0x2d   : > { %2279 = shalt.err (!%p2276_p12)
}
  0x2e   : > { %s3058_s5 = sld [smem:[#allocation31_spill]]  ;;  %s1846_s26 = sadd.s32 4294967294, %s2508_s10  }
  0x2f   : > { %s48_s13 = sadd.s32 1, %s2504_s9  ;;  %s57_s14 = sadd.s32 1, %s2496_s29 }
  0x30   : > { %p50_p13 = scmp.ge.s32.totalorder %s48_s13, 2  ;;  %p64_p0 = scmp.ne.s32.totalorder %s2496_s29, %s2492_s28 }
  0x31   : > { %p65_p2 = scmp.eq.s32.totalorder %s2508_s10, 0  ;;  %p70_p8 = scmp.ne.s32.totalorder %s2492_s28, %s2488_s27 }
  0x32   : > { %s3093_s13 = smov (%p50_p13, %s48_s13), 0  ;;  %p273_p9 = scmp.eq.s32.totalorder %s2612_s11, 1 }
  0x33   : > { %3059 = sst [smem:[#allocation25_spill]] %s3093_s13  ;;  %p2662_p4 = por %p65_p2, %p64_p0 }
  0x34   : > { %2098 = dma.hbm_to_vmem [thread:$0]  (!%p2626_p6), %s3058_s5, 512, %s331_s17, [#allocation14], %s3033_s19, %s3033_s19, %s3035_s20  }
  0x35   : > { %s52_s17 = ssub.s32 %s2504_s9, %s3093_s13  ;;  %p2673_p11 = por %p3042_p1, %p70_p8 }
  0x36   : > { %p55_p10 = scmp.eq.s32.totalorder %s52_s17, 0  ;;  %p2677_p12 = por %p273_p9, %p64_p0 }
  0x37   : > { %p279_p13 = scmp.eq.s32.totalorder %s1846_s26, 1  ;;  %p2120_p5 = scmp.lt.s32.totalorder %s2508_s10, 2 }
  0x38   : > { %s3062_s21 = scalar_select %p2677_p12, 1, 0 }
  0x39   : > { %s2682_s22 = scalar_select %p55_p10, %s2496_s29, %s57_s14  }
  0x3a   : > { %p2684_p2 = por %p279_p13, %p70_p8  ;;  %s3039_s24 = sand.u32 1, %s2496_s29  }
  0x3b   : > { %3063 = sst [smem:[#allocation26_spill]] %s2682_s22  ;;  %s2691_s25 = sshll.u32 %s2504_s9, 7 }
  0x3c   : > { %s3064_s23 = scalar_select %p2684_p2, 1, 0 }
  0x3d   : > { %s2695_s17 = sshll.u32 %s3039_s24, 3  ;;  %p2699_p0 = pnand %p2120_p5, %p2662_p4 }
  0x3e   : > { %3065 = sst [smem:[#allocation27_spill]] %s3064_s23  ;;  %s382_s26 = sand.u32 1, %s2508_s10  }
  0x3f   : > { %s3067_s1 = sld [smem:[#allocation28_spill]]  ;;  %s386_s5 = scalar_lea.vmem [#allocation7], %s2695_s17 }
  0x40   : > { %s393_s13 = sshll.u32 %s386_s5, 4  ;;  %s2709_s9 = scalar_lea.sflag [#allocation8], %s382_s26  ;;  %s394_s13 = int_to_ptr.vmem [resolvable:$true] %s393_s13 }
  0x41   : > { %p3044_p8 = pneg %p2699_p0  ;;  %s2293_s16 = scalar_lea.vmem %s394_s13, 128 }
  0x42   : > { %p2294_p9 = scmp.ne.s32.totalorder %s394_s13, %s2293_s16  ;;  %s2514_s24 = smov [#allocation7]  }
  0x43   : > { %s2298_s22 = sshll.u32 %s2514_s24, 4  ;;  %s2299_s22 = int_to_ptr.vmem [resolvable:$false] %s2298_s22 }
  0x44   : > { %p2296_p5 = pnand %p2294_p9, %p3044_p8  ;;  %s2300_s10 = scalar_lea.vmem %s2299_s22, 256 }
  0x45   : > { %s391_s3 = scalar_lea.hbm %s3067_s1, %s2691_s25  ;;  %p2301_p10 = scmp.lt.s32.totalorder %s394_s13, %s2299_s22 }
  0x46   : > { %p2297_p4 = pneg %p2296_p5  ;;  %p2302_p13 = scmp.lt.s32.totalorder %s2300_s10, %s2293_s16 }
  0x48   : > { %p2303_p1 = por %p2302_p13, %p2301_p10 }
  0x4a   : > { %p2304_p7 = pnand %p2303_p1, %p2297_p4 }
  0x4c   : > { %2307 = shalt.err (!%p2304_p7)
}
  0x4d   : > { %2108 = dma.hbm_to_vmem [thread:$0]  (!%p2699_p0), %s391_s3, 128, %s394_s13, %s2709_s9  }
  0x4e   : > { %s2515_s5 = smov [#allocation12]   ;;  %s2516_s26 = smov [#allocation15]  }
  0x4f   : > { %s315_s20 = sshll.u32 %s2515_s5, 4  ;;  %s346_s14 = sshll.u32 %s2516_s26, 4  ;;  %s316_s20 = int_to_ptr.vmem [resolvable:$true] %s315_s20  ;;  %s347_s14 = int_to_ptr.vmem [resolvable:$true] %s346_s14 }
  0x50   : > { %s2319_s1 = scalar_lea.vmem %s316_s20, 512  ;;  %p3068_p5 = pneg %p2626_p6 }
  0x51   : > { %p2320_p9 = scmp.ne.s32.totalorder %s316_s20, %s2319_s1  ;;  %p2327_p12 = scmp.lt.s32.totalorder %s316_s20, %s316_s20 }
  0x52   : > { %p2328_p10 = scmp.lt.s32.totalorder %s2319_s1, %s2319_s1 }
  0x53   : > { %p2322_p8 = pnand %p2320_p9, %p3068_p5 }
  0x54   : > { %p2329_p1 = por %p2328_p10, %p2327_p12 }
  0x55   : > { %p2323_p2 = pneg %p2322_p8 }
  0x57   : > { %p2330_p7 = pnand %p2329_p1, %p2323_p2 }
  0x59   : > { %2333 = shalt.err (!%p2330_p7)
}
  0x5a   : > { %s3069_s10 = smov 8   ;;  %s3070_s3 = smov 128  }
  0x5b   : > { %s3071_s4 = sld [smem:[#allocation30_spill]]  ;;  %s2345_s24 = scalar_lea.vmem %s347_s14, 512 }
  0x5c   : > { %p2346_p4 = scmp.ne.s32.totalorder %s347_s14, %s2345_s24  ;;  %p3072_p8 = pmov %p3068_p5 }
  0x5d   : > { %p2353_p12 = scmp.lt.s32.totalorder %s347_s14, %s347_s14  ;;  %p2354_p2 = scmp.lt.s32.totalorder %s2345_s24, %s2345_s24 }
  0x5e   : > { %p2348_p13 = pnand %p2346_p4, %p3072_p8 }
  0x5f   : > { %p2355_p5 = por %p2354_p2, %p2353_p12 }
  0x60   : > { %p2349_p9 = pneg %p2348_p13 }
  0x61   : > { %2095 = dma.hbm_to_vmem [thread:$0]  (!%p2626_p6), %s3071_s4, 512, %s316_s20, [#allocation11], %s3070_s3, %s3070_s3, %s3069_s10  }
  0x62   : > { %p2356_p10 = pnand %p2355_p5, %p2349_p9 }
  0x64   : > { %2359 = shalt.err (!%p2356_p10)
}
  0x65   : > { %2101 = dma.hbm_to_vmem [thread:$0]  (!%p2626_p6), %s3030_s6, 512, %s347_s14, [#allocation14], %s3070_s3, %s3070_s3, %s3069_s10  }
  0x66   : > { %s373_s26 = scalar_lea.hbm %s3024_s0, %s2691_s25  ;;  %s367_s13 = scalar_lea.vmem [#allocation4], %s2695_s17 }
  0x67   : > { %s375_s22 = sshll.u32 %s367_s13, 4  ;;  %s409_s4 = scalar_lea.hbm %s3026_s2, %s2691_s25  ;;  %s376_s22 = int_to_ptr.vmem [resolvable:$true] %s375_s22 }
  0x68   : > { %s3073_s23 = sand.u32 1, %s2496_s29   ;;  %s2373_s1 = scalar_lea.vmem %s376_s22, 128 }
  0x69   : > { %s364_s27 = scalar_lea.sflag [#allocation5], %s3073_s23  ;;  %p2374_p1 = scmp.ne.s32.totalorder %s376_s22, %s2373_s1 }
  0x6a   : > { %p3074_p7 = pneg %p2699_p0  ;;  %s2517_s14 = smov [#allocation4]  }
  0x6b   : > { %s2378_s10 = sshll.u32 %s2517_s14, 4  ;;  %s2379_s10 = int_to_ptr.vmem [resolvable:$false] %s2378_s10 }
  0x6c   : > { %p2376_p4 = pnand %p2374_p1, %p3074_p7  ;;  %s2380_s3 = scalar_lea.vmem %s2379_s10, 256 }
  0x6d   : > { %p2381_p6 = scmp.lt.s32.totalorder %s376_s22, %s2379_s10  ;;  %p2382_p13 = scmp.lt.s32.totalorder %s2380_s3, %s2373_s1 }
  0x6e   : > { %p2377_p8 = pneg %p2376_p4 }
  0x6f   : > { %p2383_p9 = por %p2382_p13, %p2381_p6 }
  0x71   : > { %p2384_p12 = pnand %p2383_p9, %p2377_p8 }
  0x73   : > { %2387 = shalt.err (!%p2384_p12)
}
  0x74   : > { %2105 = dma.hbm_to_vmem [thread:$0]  (!%p2699_p0), %s373_s26, 128, %s376_s22, %s364_s27  }
  0x75   : > { %s404_s23 = scalar_lea.vmem [#allocation9], %s2695_s17  ;;  %p3075_p5 = pmov %p3074_p7 }
  0x76   : > { %s411_s16 = sshll.u32 %s404_s23, 4  ;;  %s2518_s20 = smov [#allocation9]   ;;  %s412_s16 = int_to_ptr.vmem [resolvable:$true] %s411_s16 }
  0x77   : > { %s2401_s5 = scalar_lea.vmem %s412_s16, 128  ;;  %s2406_s13 = sshll.u32 %s2518_s20, 4  ;;  %s2407_s13 = int_to_ptr.vmem [resolvable:$false] %s2406_s13 }
  0x78   : > { %p2402_p2 = scmp.ne.s32.totalorder %s412_s16, %s2401_s5  ;;  %s2408_s15 = scalar_lea.vmem %s2407_s13, 256 }
  0x79   : > { %p2409_p7 = scmp.lt.s32.totalorder %s412_s16, %s2407_s13  ;;  %p2410_p4 = scmp.lt.s32.totalorder %s2408_s15, %s2401_s5 }
  0x7a   : > { %p2404_p10 = pnand %p2402_p2, %p3075_p5 }
  0x7b   : > { %p2411_p8 = por %p2410_p4, %p2409_p7 }
  0x7c   : > { %p2405_p1 = pneg %p2404_p10 }
  0x7e   : > { %p2412_p6 = pnand %p2411_p8, %p2405_p1 }
  0x80   : > { %2415 = shalt.err (!%p2412_p6)
}
  0x81   : > { %2111 = dma.hbm_to_vmem [thread:$0]  (!%p2699_p0), %s409_s4, 128, %s412_s16, %s2709_s9  }
  0x82   : > { %420 = sbr.rel (%p2617_p3) target bundleno = 1439 (0x59f), region = 52  ;;  %s2772_s26 = sand.u32 (!%p2617_p3), 1, %s2492_s28  }
  0x83   : > { %s2775_s22 = sshll.u32 (!%p2617_p3), %s2772_s26, 3  ;;  %s423_s19 = scalar_lea.sflag (!%p2617_p3), [#allocation5], %s2772_s26 }
  0x84   : > { %s426_s24 = scalar_lea.vmem (!%p2617_p3), [#allocation4], %s2775_s22 }
  0x87   : > { %2467 = dma.done.wait (%p2673_p11), %s423_s19, 128  }
  0x88   : > { %2469 = vsyncadd (%p2673_p11), %s423_s19, 4294967168  ;;  %s431_s4 = sand.u32 1, %s2612_s11   ;;  %s435_s12 = scalar_lea.vmem [#allocation7], %s2775_s22 }
  0x89   : > { %s432_s9 = scalar_lea.sflag [#allocation8], %s431_s4 }
  0x8a   : > { %2471 = dma.done.wait (%p2673_p11), %s432_s9, 256  }
  0x8b   : > { %2473 = vsyncadd (%p2673_p11), %s432_s9, 4294967040  ;;  %s444_s25 = scalar_lea.vmem [#allocation9], %s2775_s22  ;;  %p3076_p3 = scmp.eq.s32.totalorder %s2612_s11, 0 }
  0x8d   : > { %2475 = dma.done.wait (%p3076_p3), [#allocation11], 1024   ;;  %p3077_p0 = pmov %p3076_p3 }
  0x8f   : > { %2477 = vsyncadd (%p3077_p0), [#allocation11], 4294966272  ;;  %p3078_p13 = pmov %p3077_p0 }
  0x90   : > { %p3079_p9 = pmov %p3077_p0 }
  0x91   : > { %2479 = dma.done.wait (%p3078_p13), [#allocation14], 1024  }
  0x92   : > { %2481 = vsyncadd (%p3079_p9), [#allocation14], 4294966272  ;;  %v2519_v0 = vmov 0.0   ;;  %vm2520_vm0 = vmmov 0   ;;  %v576_v1 = vld [vmem:[#allocation12 + $0x10] sm:$0xff]  ;;  %v577_v2 = vld [vmem:[#allocation12 + $0x18] sm:$0xff] }
  0x93   : > { %1945 = vmatprep.subr.bf16.mxu1 %v2519_v0  ;;  %1937 = vmatprep.subr.bf16.mxu0 %v2519_v0  ;;  %v524_v3 = vld [vmem:[#allocation10 + $0x10] sm:$0xff]  ;;  %v579_v4 = vpack.c.bf16 %v577_v2, %v576_v1  ;;  %v525_v5 = vld [vmem:[#allocation10 + $0x18] sm:$0xff]  ;;  %v574_v6 = vld [vmem:[#allocation12] sm:$0xff]  ;;  %vm516_vm1 = vcmask 261120   ;;  %vm676_vm2 = vcmask 31744   ;;  %s2521_s11 = smov 120  }
  0x94   : > { %1949 = vmatprep.mubr.msk.bf16.mxu1 %vm2520_vm0, %v2519_v0  ;;  %1941 = vmatprep.mubr.msk.bf16.mxu0 %vm2520_vm0, %v2519_v0  ;;  %v575_v7 = vld [vmem:[#allocation12 + $0x8] sm:$0xff]  ;;  %v527_v8 = vpack.c.bf16 %v525_v5, %v524_v3  ;;  %v522_v9 = vld [vmem:[#allocation10] sm:$0xff]  ;;  %v518_v14 = vld [vmem:[%s426_s24] sm:$0xff]  ;;  %s2522_s18 = smov 124   ;;  %s2523_s1 = smov 116   ;;  %vm737_vm3 = vcmask 1043456  }
  0x95   : > { %v523_v10 = vld [vmem:[#allocation10 + $0x8] sm:$0xff]  ;;  %1946 = vmatpush3.bf16.msra.mxu1 %v579_v4  ;;  %v578_v11 = vpack.c.bf16 %v575_v7, %v574_v6  ;;  %v626_v15 = vld [vmem:[#allocation13 + $0x10] sm:$0xff]  ;;  %v627_v16 = vld [vmem:[#allocation13 + $0x18] sm:$0xff]  ;;  %v521_v18 = vpack.c.bf16 %v518_v14, %v518_v14  ;;  %s2524_s14 = smov 112   ;;  %s2525_s10 = smov 108   ;;  %vm723_vm4 = vcmask 64512  }
  0x96   : > { %v519_v12 = vld [vmem:[%s435_s12] sm:$0xff]  ;;  %1938 = vmatpush3.bf16.msra.mxu0 %v527_v8  ;;  %1947 = vmatprep.subr.bf16.mxu1 %v2519_v0  ;;  %v526_v13 = vpack.c.bf16 %v523_v10, %v522_v9  ;;  %v629_v19 = vpack.c.bf16 %v627_v16, %v626_v15  ;;  %v520_v23 = vld [vmem:[%s444_s25] sm:$0xff]  ;;  %s2526_s3 = smov 104   ;;  %s2527_s23 = smov 100   ;;  %vm901_vm5 = vcmask 64544   ;;  %vm1017_vm6 = vcmask 97344  }
  0x97   : > { %1939 = vmatprep.subr.bf16.mxu0 %v2519_v0  ;;  %v573_v17 = vpack.c.bf16 %v519_v12, %v519_v12  ;;  %v624_v20 = vld [vmem:[#allocation13] sm:$0xff]  ;;  %v625_v21 = vld [vmem:[#allocation13 + $0x8] sm:$0xff]  ;;  %v623_v24 = vpack.c.bf16 %v520_v23, %v520_v23  ;;  %s2528_s16 = smov 4   ;;  %s2529_s5 = smov 8   ;;  %vm1133_vm7 = vcmask 130144   ;;  %vm1249_vm8 = vcmask 162944  }
  0x98   : > { %v628_v22 = vpack.c.bf16 %v625_v21, %v624_v20  ;;  %s2530_s20 = smov 12   ;;  %s2531_s13 = smov 16   ;;  %vm1365_vm9 = vcmask 195744   ;;  %vm1481_vm10 = vcmask 228544   ;;  %vm1597_vm11 = vcmask 261344  }
  0x99   : > { %1948 = vmatpush3.bf16.msra.mxu1 %v578_v11  ;;  %s2532_s15 = smov 20   ;;  %s2533_s27 = smov 24  }
  0x9a   : > { %1940 = vmatpush3.bf16.msra.mxu0 %v526_v13  ;;  %1961 = vmatprep.subr.bf16.mxu1 %v2519_v0  ;;  %s2534_s24 = smov 28   ;;  %s1890_s4 = sshll.u32 %s2500_s30, 7 }
  0x9b   : > { %1953 = vmatprep.subr.bf16.mxu0 %v2519_v0  ;;  %s502_s9 = scalar_lea.vmem [#allocation16], %s2775_s22  ;;  %p3080_p12 = scmp.ne.s32.totalorder %s3062_s21, 0 }
  0x9c   : > { %1950 = vmatmul.mubr.msk.bf16.vlgmr.msra.gmra.mxu1 %vm516_vm1, %v573_v17  ;;  %s1673_s12 = sshll.u32 %s502_s9, 4  ;;  %s1674_s12 = int_to_ptr.vmem [resolvable:$true] %s1673_s12 }
  0x9d   : > { %1942 = vmatmul.mubr.msk.bf16.vlgmr.msra.gmra.mxu0 %vm516_vm1, %v521_v18  ;;  %1963 = vmatprep.mubr.msk.bf16.mxu1 %vm2520_vm0, %v2519_v0 }
  0x9e   : > { %1954 = vmatpush3.bf16.msra.mxu0 %v629_v19  ;;  %1957 = vmatprep.mubr.msk.bf16.mxu0 %vm2520_vm0, %v2519_v0 }
  0x9f   : > { %1955 = vmatprep.subr.bf16.mxu0 %v2519_v0 }
  0xa2   : > { %1956 = vmatpush3.bf16.msra.mxu0 %v628_v22 }
  0xa3   : > { %1967 = vmatprep.subr.bf16.mxu0 %v2519_v0 }
  0xa5   : > { %1958 = vmatmul.mubr.msk.bf16.vlgmr.msra.gmra.mxu0 %vm516_vm1, %v623_v24 }
  0xa6   : > { %1969 = vmatprep.mubr.msk.bf16.mxu0 %vm2520_vm0, %v2519_v0 }
 0x15c   : > { %v617_v25 = vpop.f32.mrf.mxu1 }
 0x15d   : > { %v674_v26 = vpack.c.bf16 %v617_v25, %v617_v25  ;;  %v566_v27 = vpop.f32.mrf.mxu0 }
 0x15e   : > { %v572_v28 = vmul.f32 0.17677669, %v566_v27  ;;  %v1951_v29 = vpop.f32.mrf.mxu1 }
 0x15f   : > { %905 = vrot.lane.b32.xlu1 %v674_v26, %s2521_s11  ;;  %788 = vrot.lane.b32.xlu0 %v674_v26, %s2522_s18  ;;  %v1943_v30 = vpop.f32.mrf.mxu0  ;;  %v681_v31 = vsel %vm676_vm2, %v674_v26, 0 }
 0x160   : > { %v673_v32 = vpack.c.bf16 %v572_v28, %v572_v28  ;;  %v620_v33 = vpop.f32.mrf.mxu1  ;;  %1962 = vmatpush3.bf16.xpose.msra.mxu1 %v681_v31 }
 0x161   : > { %v569_v34 = vpop.f32.mrf.mxu0  ;;  %1973 = vmatprep.subr.bf16.mxu1 %v2519_v0 }
 0x162   : > { %v1952_v35 = vpop.f32.mrf.mxu1 }
 0x163   : > { %903 = vrot.lane.b32.xlu1 %v673_v32, %s2521_s11  ;;  %785 = vrot.lane.b32.xlu0 %v673_v32, %s2522_s18  ;;  %v1944_v36 = vpop.f32.mrf.mxu0 }
 0x165   : > { %v667_v37 = vpop.f32.mrf.mxu0 }
 0x166   : > { %v2842_v38 = vpack.c.bf16 %v667_v37, %v667_v37 }
 0x167   : > { %1019 = vrot.lane.b32.xlu1 %v673_v32, %s2523_s1  ;;  %1021 = vrot.lane.b32.xlu0 %v674_v26, %s2523_s1  ;;  %v1959_v39 = vpop.f32.mrf.mxu0 }
 0x168   : > { %1964 = vmatmul.mubr.msk.bf16.vlgmr.msra.gmra.mxu1 %vm676_vm2, %v673_v32  ;;  %v739_v42 = vsel %vm737_vm3, %v2842_v38, 0 }
 0x169   : > { %1975 = vmatprep.mubr.msk.bf16.mxu1 %vm2520_vm0, %v2519_v0  ;;  %v670_v40 = vpop.f32.mrf.mxu0  ;;  %1968 = vmatpush3.bf16.msra.mxu0 %v739_v42 }
 0x16a   : > { %1979 = vmatprep.subr.bf16.mxu0 %v2519_v0 }
 0x16b   : > { %1135 = vrot.lane.b32.xlu1 %v673_v32, %s2524_s14  ;;  %1137 = vrot.lane.b32.xlu0 %v674_v26, %s2524_s14  ;;  %v1960_v41 = vpop.f32.mrf.mxu0 }
 0x16f   : > { %1251 = vrot.lane.b32.xlu1 %v673_v32, %s2525_s10  ;;  %1253 = vrot.lane.b32.xlu0 %v674_v26, %s2525_s10 }
 0x173   : > { %1367 = vrot.lane.b32.xlu1 %v673_v32, %s2526_s3  ;;  %1369 = vrot.lane.b32.xlu0 %v674_v26, %s2526_s3 }
 0x177   : > { %1483 = vrot.lane.b32.xlu1 %v673_v32, %s2527_s23  ;;  %1485 = vrot.lane.b32.xlu0 %v674_v26, %s2527_s23 }
 0x17b   : > { %847 = vrot.lane.b32.xlu0 %v2842_v38, %s2522_s18  ;;  %963 = vrot.lane.b32.xlu1 %v2842_v38, %s2521_s11  ;;  %s2981_s18 = scalar_lea.hbm %s3032_s8, %s1890_s4 }
 0x1d1   : > { %v789_v43 = vpop.permute.xlu0 %788  ;;  %v906_v45 = vpop.permute.xlu1 %905 }
 0x1d2   : > { %v794_v44 = vsel %vm676_vm2, %v789_v43, 0  ;;  %v911_v47 = vsel %vm676_vm2, %v906_v45, 0 }
 0x1d3   : > { %1974 = vmatpush3.bf16.xpose.msra.mxu1 %v794_v44 }
 0x1d4   : > { %1985 = vmatprep.subr.bf16.mxu1 %v2519_v0 }
 0x1d5   : > { %v786_v46 = vpop.permute.xlu0 %785  ;;  %v904_v49 = vpop.permute.xlu1 %903 }
 0x1d9   : > { %v1022_v48 = vpop.permute.xlu0 %1021  ;;  %v1020_v52 = vpop.permute.xlu1 %1019 }
 0x1da   : > { %1976 = vmatmul.mubr.msk.bf16.vlgmr.msra.gmra.mxu1 %vm676_vm2, %v786_v46  ;;  %v1027_v50 = vsel %vm676_vm2, %v1022_v48, 0 }
 0x1db   : > { %1986 = vmatpush3.bf16.xpose.msra.mxu1 %v911_v47  ;;  %1987 = vmatprep.mubr.msk.bf16.mxu1 %vm2520_vm0, %v2519_v0 }
 0x1dc   : > { %1997 = vmatprep.subr.bf16.mxu1 %v2519_v0 }
 0x1dd   : > { %v1138_v51 = vpop.permute.xlu0 %1137  ;;  %v1136_v55 = vpop.permute.xlu1 %1135 }
 0x1de   : > { %v1143_v53 = vsel %vm676_vm2, %v1138_v51, 0 }
 0x1e1   : > { %v1254_v54 = vpop.permute.xlu0 %1253  ;;  %v1252_v58 = vpop.permute.xlu1 %1251 }
 0x1e2   : > { %1988 = vmatmul.mubr.msk.bf16.vlgmr.msra.gmra.mxu1 %vm676_vm2, %v904_v49  ;;  %v1259_v56 = vsel %vm676_vm2, %v1254_v54, 0 }
 0x1e3   : > { %1998 = vmatpush3.bf16.xpose.msra.mxu1 %v1027_v50  ;;  %1999 = vmatprep.mubr.msk.bf16.mxu1 %vm2520_vm0, %v2519_v0 }
 0x1e4   : > { %2009 = vmatprep.subr.bf16.mxu1 %v2519_v0 }
 0x1e5   : > { %v1370_v57 = vpop.permute.xlu0 %1369  ;;  %v1368_v61 = vpop.permute.xlu1 %1367 }
 0x1e6   : > { %v1375_v59 = vsel %vm676_vm2, %v1370_v57, 0 }
 0x1e9   : > { %v1486_v60 = vpop.permute.xlu0 %1485  ;;  %v1484_v63 = vpop.permute.xlu1 %1483 }
 0x1ea   : > { %2000 = vmatmul.mubr.msk.bf16.vlgmr.msra.gmra.mxu1 %vm676_vm2, %v1020_v52  ;;  %v1491_v62 = vsel %vm676_vm2, %v1486_v60, 0 }
 0x1eb   : > { %2010 = vmatpush3.bf16.xpose.msra.mxu1 %v1143_v53  ;;  %2011 = vmatprep.mubr.msk.bf16.mxu1 %vm2520_vm0, %v2519_v0 }
 0x1ec   : > { %2021 = vmatprep.subr.bf16.mxu1 %v2519_v0 }
 0x1ed   : > { %v848_v19 = vpop.permute.xlu0 %847  ;;  %v964_v49 = vpop.permute.xlu1 %963 }
 0x1ee   : > { %v853_v36 = vsel %vm737_vm3, %v848_v19, 0 }
 0x1f2   : > { %2012 = vmatmul.mubr.msk.bf16.vlgmr.msra.gmra.mxu1 %vm676_vm2, %v1136_v55 }
 0x1f3   : > { %2022 = vmatpush3.bf16.xpose.msra.mxu1 %v1259_v56  ;;  %2023 = vmatprep.mubr.msk.bf16.mxu1 %vm2520_vm0, %v2519_v0 }
 0x1f4   : > { %2033 = vmatprep.subr.bf16.mxu1 %v2519_v0 }
 0x1fa   : > { %2024 = vmatmul.mubr.msk.bf16.vlgmr.msra.gmra.mxu1 %vm676_vm2, %v1252_v58 }
 0x1fb   : > { %2034 = vmatpush3.bf16.xpose.msra.mxu1 %v1375_v59  ;;  %2035 = vmatprep.mubr.msk.bf16.mxu1 %vm2520_vm0, %v2519_v0 }
 0x1fc   : > { %2045 = vmatprep.subr.bf16.mxu1 %v2519_v0 }
 0x202   : > { %2036 = vmatmul.mubr.msk.bf16.vlgmr.msra.gmra.mxu1 %vm676_vm2, %v1368_v61 }
 0x203   : > { %2046 = vmatpush3.bf16.xpose.msra.mxu1 %v1491_v62  ;;  %2047 = vmatprep.mubr.msk.bf16.mxu1 %vm2520_vm0, %v2519_v0  ;;  %v969_v62 = vsel %vm737_vm3, %v964_v49, 0 }
 0x204   : > { %2057 = vmatprep.subr.bf16.mxu1 %v2519_v0 }
 0x20a   : > { %2048 = vmatmul.mubr.msk.bf16.vlgmr.msra.gmra.mxu1 %vm676_vm2, %v1484_v63 }
 0x20b   : > { %2061 = vmatprep.mubr.msk.bf16.mxu1 %vm2520_vm0, %v2519_v0 }
 0x228   : > { %v717_v1 = vpop.f32.mrf.mxu1 }
 0x229   : > { %v724_v2 = vsel %vm723_vm4, %v717_v1, -inf }
 0x22a   : > { %v1965_v3 = vpop.f32.mrf.mxu1  ;;  %725 = vmax.xlane.f32.xlu0 %v724_v2 }
 0x22c   : > { %v720_v4 = vpop.f32.mrf.mxu1 }
 0x22e   : > { %v1966_v5 = vpop.f32.mrf.mxu1 }
 0x29a   : > { %v830_v6 = vpop.f32.mrf.mxu1 }
 0x29b   : > { %v836_v7 = vsel %vm723_vm4, %v830_v6, -inf }
 0x29c   : > { %v1977_v8 = vpop.f32.mrf.mxu1  ;;  %837 = vmax.xlane.f32.xlu1 %v836_v7 }
 0x29e   : > { %v833_v9 = vpop.f32.mrf.mxu1 }
 0x2a0   : > { %v1978_v10 = vpop.f32.mrf.mxu1 }
 0x2a2   : > { %v947_v11 = vpop.f32.mrf.mxu1 }
 0x2a3   : > { %v953_v12 = vsel %vm723_vm4, %v947_v11, -inf }
 0x2a4   : > { %v1989_v13 = vpop.f32.mrf.mxu1  ;;  %954 = vmax.xlane.f32.xlu0 %v953_v12 }
 0x2a6   : > { %v950_v14 = vpop.f32.mrf.mxu1 }
 0x2a8   : > { %v1990_v15 = vpop.f32.mrf.mxu1 }
 0x2aa   : > { %v1063_v16 = vpop.f32.mrf.mxu1 }
 0x2ab   : > { %v1069_v17 = vsel %vm723_vm4, %v1063_v16, -inf }
 0x2ac   : > { %v2001_v18 = vpop.f32.mrf.mxu1  ;;  %1070 = vmax.xlane.f32.xlu0 %v1069_v17 }
 0x2ad   : > { %1079 = vrot.lane.b32.xlu1 %v2842_v38, %s2523_s1  ;;  %s1659_s1 = scalar_lea.sflag [#allocation6], %s2772_s26 }
 0x2ae   : > { %v1066_v20 = vpop.f32.mrf.mxu1 }
 0x2b0   : > { %v2002_v21 = vpop.f32.mrf.mxu1 }
 0x2b2   : > { %v2892_v22 = vpop.f32.mrf.mxu1 }
 0x2b3   : > { %v726_v23 = vpop.xlane.xlu0 %725  ;;  %v1185_v45 = vsel %vm723_vm4, %v2892_v22, -inf }
 0x2b4   : > { %v727_v24 = vsub.f32 %v717_v1, %v726_v23  ;;  %v2013_v25 = vpop.f32.mrf.mxu1 }
 0x2b6   : > { %v728_v26 = vmul.f32 1.442695, %v727_v24  ;;  %v1182_v27 = vpop.f32.mrf.mxu1 }
 0x2b8   : > { %2196 = vpow2.f32 %v728_v26  ;;  %v2014_v28 = vpop.f32.mrf.mxu1 }
 0x2ba   : > { %v2894_v29 = vpop.f32.mrf.mxu1 }
 0x2bb   : > { %v1301_v46 = vsel %vm723_vm4, %v2894_v29, -inf }
 0x2bc   : > { %v2025_v30 = vpop.f32.mrf.mxu1 }
 0x2be   : > { %v1298_v31 = vpop.f32.mrf.mxu1 }
 0x2c0   : > { %v2026_v32 = vpop.f32.mrf.mxu1 }
 0x2c2   : > { %v2896_v33 = vpop.f32.mrf.mxu1  ;;  %1195 = vrot.lane.b32.xlu0 %v2842_v38, %s2524_s14  ;;  %s2416_s14 = scalar_lea.vmem %s1674_s12, 128 }
 0x2c3   : > { %v1417_v48 = vsel %vm723_vm4, %v2896_v33, -inf  ;;  %p2417_p11 = scmp.ne.s32.totalorder %s1674_s12, %s2416_s14 }
 0x2c4   : > { %v2037_v34 = vpop.f32.mrf.mxu1 }
 0x2c5   : > { %v2900_v35 = vpop.eup %2196  ;;  %p2418_p2 = pnand %p2417_p11, %p3080_p12 }
 0x2c6   : > { %v1414_v37 = vpop.f32.mrf.mxu1  ;;  %v733_v39 = vpack.c.bf16 %v2900_v35, %v2900_v35 }
 0x2c7   : > { %p2419_p5 = pneg %p2418_p2 }
 0x2c8   : > { %1970 = vmatmul.mubr.msk.bf16.vlgmr.msra.gmra.mxu0 %vm723_vm4, %v733_v39  ;;  %v2038_v40 = vpop.f32.mrf.mxu1 }
 0x2c9   : > { %1980 = vmatpush3.bf16.msra.mxu0 %v853_v36  ;;  %1981 = vmatprep.mubr.msk.bf16.mxu0 %vm2520_vm0, %v2519_v0  ;;  %v730_v40 = vsel %vm723_vm4, %v2900_v35, 0.0 }
 0x2ca   : > { %v2908_v41 = vpop.f32.mrf.mxu1  ;;  %1991 = vmatprep.subr.bf16.mxu0 %v2519_v0 }
 0x2cb   : > { %v1533_v47 = vsel %vm723_vm4, %v2908_v41, -inf }
 0x2cc   : > { %v2049_v42 = vpop.f32.mrf.mxu1 }
 0x2ce   : > { %v1530_v43 = vpop.f32.mrf.mxu1 }
 0x2d0   : > { %v2050_v44 = vpop.f32.mrf.mxu1 }
 0x2d1   : > { %1186 = vmax.xlane.f32.xlu1 %v1185_v45 }
 0x2d5   : > { %1302 = vmax.xlane.f32.xlu1 %v1301_v46 }
 0x2d9   : > { %1534 = vmax.xlane.f32.xlu1 %v1533_v47 }
 0x2e1   : > { %1418 = vmax.xlane.f32.xlu0 %v1417_v48 }
 0x2ea   : > { %1311 = vrot.lane.b32.xlu1 %v2842_v38, %s2525_s10  ;;  %s2535_s10 = smov [#allocation16]  }
 0x2f7   : > { %1427 = vrot.lane.b32.xlu0 %v2842_v38, %s2526_s3  ;;  %s2420_s3 = sshll.u32 %s2535_s10, 4  ;;  %s2421_s3 = int_to_ptr.vmem [resolvable:$false] %s2420_s3 }
 0x2f8   : > { %s2422_s30 = scalar_lea.vmem %s2421_s3, 256  ;;  %p2423_p10 = scmp.lt.s32.totalorder %s1674_s12, %s2421_s3 }
 0x2f9   : > { %p2424_p1 = scmp.lt.s32.totalorder %s2422_s30, %s2416_s14 }
 0x2fb   : > { %1543 = vrot.lane.b32.xlu0 %v2842_v38, %s2527_s23  ;;  %p2425_p7 = por %p2424_p1, %p2423_p10 }
 0x2fd   : > { %p2426_p4 = pnand %p2425_p7, %p2419_p5 }
 0x325   : > { %v838_v50 = vpop.xlane.xlu1 %837 }
 0x326   : > { %v839_v51 = vsub.f32 %v830_v6, %v838_v50 }
 0x328   : > { %v840_v52 = vmul.f32 1.442695, %v839_v51 }
 0x329   : > { %v1080_v63 = vpop.permute.xlu1 %1079 }
 0x32a   : > { %2198 = vpow2.f32 %v840_v52  ;;  %v1085_v3 = vsel %vm737_vm3, %v1080_v63, 0 }
 0x32d   : > { %v955_v53 = vpop.xlane.xlu0 %954 }
 0x32e   : > { %v956_v54 = vsub.f32 %v947_v11, %v955_v53 }
 0x330   : > { %v957_v55 = vmul.f32 1.442695, %v956_v54 }
 0x332   : > { %2200 = vpow2.f32 %v957_v55 }
 0x335   : > { %v1071_v56 = vpop.xlane.xlu0 %1070 }
 0x336   : > { %v1072_v57 = vsub.f32 %v1063_v16, %v1071_v56 }
 0x337   : > { %v2199_v58 = vpop.eup %2198 }
 0x338   : > { %v1073_v59 = vmul.f32 1.442695, %v1072_v57  ;;  %v842_v60 = vsel %vm723_vm4, %v2199_v58, 0.0  ;;  %v845_v61 = vpack.c.bf16 %v2199_v58, %v2199_v58 }
 0x339   : > { %843 = vadd.xlane.f32.xlu1 %v842_v60  ;;  %v1196_v5 = vpop.permute.xlu0 %1195 }
 0x33a   : > { %2202 = vpow2.f32 %v1073_v59  ;;  %1982 = vmatmul.mubr.msk.bf16.vlgmr.msra.gmra.mxu0 %vm723_vm4, %v845_v61  ;;  %v1201_v8 = vsel %vm737_vm3, %v1196_v5, 0 }
 0x33b   : > { %1992 = vmatpush3.bf16.msra.mxu0 %v969_v62  ;;  %1993 = vmatprep.mubr.msk.bf16.mxu0 %vm2520_vm0, %v2519_v0 }
 0x33c   : > { %2003 = vmatprep.subr.bf16.mxu0 %v2519_v0 }
 0x33f   : > { %v2201_v38 = vpop.eup %2200 }
 0x340   : > { %v959_v1 = vsel %vm723_vm4, %v2201_v38, 0.0  ;;  %v962_v2 = vpack.c.bf16 %v2201_v38, %v2201_v38 }
 0x341   : > { %960 = vadd.xlane.f32.xlu0 %v959_v1 }
 0x342   : > { %1994 = vmatmul.mubr.msk.bf16.vlgmr.msra.gmra.mxu0 %vm723_vm4, %v962_v2 }
 0x343   : > { %2004 = vmatpush3.bf16.msra.mxu0 %v1085_v3  ;;  %2005 = vmatprep.mubr.msk.bf16.mxu0 %vm2520_vm0, %v2519_v0 }
 0x344   : > { %2015 = vmatprep.subr.bf16.mxu0 %v2519_v0 }
 0x347   : > { %v2203_v4 = vpop.eup %2202 }
 0x348   : > { %v1075_v6 = vsel %vm723_vm4, %v2203_v4, 0.0  ;;  %v1078_v7 = vpack.c.bf16 %v2203_v4, %v2203_v4 }
 0x349   : > { %1076 = vadd.xlane.f32.xlu0 %v1075_v6 }
 0x34a   : > { %2006 = vmatmul.mubr.msk.bf16.vlgmr.msra.gmra.mxu0 %vm723_vm4, %v1078_v7 }
 0x34b   : > { %2016 = vmatpush3.bf16.msra.mxu0 %v1201_v8  ;;  %2017 = vmatprep.mubr.msk.bf16.mxu0 %vm2520_vm0, %v2519_v0 }
 0x34c   : > { %2027 = vmatprep.subr.bf16.mxu0 %v2519_v0 }
 0x35a   : > { %v1187_v9 = vpop.xlane.xlu1 %1186 }
 0x35b   : > { %v1188_v10 = vsub.f32 %v2892_v22, %v1187_v9 }
 0x35d   : > { %v1189_v11 = vmul.f32 1.442695, %v1188_v10 }
 0x35e   : > { %v1303_v12 = vpop.xlane.xlu1 %1302 }
 0x35f   : > { %2204 = vpow2.f32 %v1189_v11  ;;  %v1304_v13 = vsub.f32 %v2894_v29, %v1303_v12 }
 0x361   : > { %v1305_v14 = vmul.f32 1.442695, %v1304_v13 }
 0x362   : > { %v1535_v15 = vpop.xlane.xlu1 %1534 }
 0x363   : > { %2206 = vpow2.f32 %v1305_v14  ;;  %v1536_v16 = vsub.f32 %v2908_v41, %v1535_v15 }
 0x365   : > { %v1537_v17 = vmul.f32 1.442695, %v1536_v16 }
 0x366   : > { %v1312_v21 = vpop.permute.xlu1 %1311 }
 0x367   : > { %2208 = vpow2.f32 %v1537_v17  ;;  %v1317_v25 = vsel %vm737_vm3, %v1312_v21, 0  ;;  %v1604_v21 = vld [vmem:[#allocation15 + $0x10] sm:$0xff] }
 0x36a   : > { %v1419_v18 = vpop.xlane.xlu0 %1418 }
 0x36b   : > { %v1420_v19 = vsub.f32 %v2896_v33, %v1419_v18 }
 0x36c   : > { %v2205_v20 = vpop.eup %2204 }
 0x36d   : > { %v1421_v23 = vmul.f32 1.442695, %v1420_v19  ;;  %v1191_v22 = vsel %vm723_vm4, %v2205_v20, 0.0  ;;  %v1194_v24 = vpack.c.bf16 %v2205_v20, %v2205_v20 }
 0x36e   : > { %1192 = vadd.xlane.f32.xlu1 %v1191_v22  ;;  %v1428_v29 = vpop.permute.xlu0 %1427  ;;  %v1602_v22 = vld [vmem:[#allocation15] sm:$0xff] }
 0x36f   : > { %2210 = vpow2.f32 %v1421_v23  ;;  %2018 = vmatmul.mubr.msk.bf16.vlgmr.msra.gmra.mxu0 %vm723_vm4, %v1194_v24  ;;  %v1433_v32 = vsel %vm737_vm3, %v1428_v29, 0  ;;  %v1605_v23 = vld [vmem:[#allocation15 + $0x18] sm:$0xff] }
 0x370   : > { %v2207_v26 = vpop.eup %2206  ;;  %2028 = vmatpush3.bf16.msra.mxu0 %v1317_v25  ;;  %2029 = vmatprep.mubr.msk.bf16.mxu0 %vm2520_vm0, %v2519_v0  ;;  %v1607_v24 = vpack.c.bf16 %v1605_v23, %v1604_v21  ;;  %v1603_v25 = vld [vmem:[#allocation15 + $0x8] sm:$0xff] }
 0x371   : > { %v1307_v27 = vsel %vm723_vm4, %v2207_v26, 0.0  ;;  %2039 = vmatprep.subr.bf16.mxu0 %v2519_v0  ;;  %v1310_v31 = vpack.c.bf16 %v2207_v26, %v2207_v26  ;;  %v1606_v29 = vpack.c.bf16 %v1603_v25, %v1602_v22 }
 0x372   : > { %1308 = vadd.xlane.f32.xlu0 %v1307_v27  ;;  %v1544_v34 = vpop.permute.xlu0 %1543  ;;  %2058 = vmatpush3.bf16.msra.mxu1 %v1607_v24 }
 0x373   : > { %v1549_v39 = vsel %vm737_vm3, %v1544_v34, 0  ;;  %2059 = vmatprep.subr.bf16.mxu1 %v2519_v0 }
 0x374   : > { %v2209_v28 = vpop.eup %2208 }
 0x375   : > { %v1539_v30 = vsel %vm723_vm4, %v2209_v28, 0.0  ;;  %v1542_v41 = vpack.c.bf16 %v2209_v28, %v2209_v28 }
 0x376   : > { %1540 = vadd.xlane.f32.xlu0 %v1539_v30  ;;  %2060 = vmatpush3.bf16.msra.mxu1 %v1606_v29 }
 0x377   : > { %2030 = vmatmul.mubr.msk.bf16.vlgmr.msra.gmra.mxu0 %vm723_vm4, %v1310_v31 }
 0x378   : > { %2040 = vmatpush3.bf16.msra.mxu0 %v1433_v32  ;;  %2041 = vmatprep.mubr.msk.bf16.mxu0 %vm2520_vm0, %v2519_v0 }
 0x379   : > { %2051 = vmatprep.subr.bf16.mxu0 %v2519_v0 }
 0x37c   : > { %v2211_v33 = vpop.eup %2210 }
 0x37d   : > { %v1423_v36 = vsel %vm723_vm4, %v2211_v33, 0.0  ;;  %v1426_v37 = vpack.c.bf16 %v2211_v33, %v2211_v33 }
 0x37e   : > { %1424 = vadd.xlane.f32.xlu1 %v1423_v36  ;;  %v1868_v36 = vld [vmem:[%s3031_s7] ss:$0 sm:$0xff] }
 0x37f   : > { %2042 = vmatmul.mubr.msk.bf16.vlgmr.msra.gmra.mxu0 %vm723_vm4, %v1426_v37  ;;  %517 = vst.msk [vmem:[#allocation2] sm:$0xff] %vm516_vm1, %v1868_v36 }
 0x380   : > { %2052 = vmatpush3.bf16.msra.mxu0 %v1549_v39  ;;  %2053 = vmatprep.mubr.msk.bf16.mxu0 %vm2520_vm0, %v2519_v0 }
 0x382   : > { %731 = vadd.xlane.f32.xlu1 %v730_v40 }
 0x387   : > { %2054 = vmatmul.mubr.msk.bf16.vlgmr.msra.gmra.mxu0 %vm723_vm4, %v1542_v41 }
 0x388   : > { %v775_v42 = vpop.f32.mrf.mxu0 }
 0x38a   : > { %v1971_v43 = vpop.f32.mrf.mxu0 }
 0x38c   : > { %v778_v44 = vpop.f32.mrf.mxu0 }
 0x38e   : > { %v1972_v45 = vpop.f32.mrf.mxu0 }
 0x3c2   : > { %v844_v46 = vpop.xlane.xlu1 %843 }
 0x3c3   : > { %2212 = vrcp.f32 %v844_v46 }
 0x3ca   : > { %v961_v47 = vpop.xlane.xlu0 %960 }
 0x3cb   : > { %2214 = vrcp.f32 %v961_v47 }
 0x3d0   : > { %v2213_v48 = vpop.eup %2212 }
 0x3d2   : > { %v1077_v49 = vpop.xlane.xlu0 %1076 }
 0x3d3   : > { %2216 = vrcp.f32 %v1077_v49 }
 0x3d8   : > { %v2215_v54 = vpop.eup %2214 }
 0x3e0   : > { %v2217_v62 = vpop.eup %2216 }
 0x3f7   : > { %v1193_v56 = vpop.xlane.xlu1 %1192 }
 0x3fa   : > { %v889_v50 = vpop.f32.mrf.mxu0 }
 0x3fb   : > { %v896_v51 = vmul.f32 %v2213_v48, %v889_v50  ;;  %v1309_v7 = vpop.xlane.xlu0 %1308  ;;  %v1599_v50 = vld [vmem:[#allocation2] sm:$0xff] }
 0x3fc   : > { %v1983_v52 = vpop.f32.mrf.mxu0 }
 0x3fd   : > { %898 = vrot.lane.b32.xlu0 %v896_v51, %s2528_s16 }
 0x3fe   : > { %v892_v35 = vpop.f32.mrf.mxu0 }
 0x3ff   : > { %v1541_v15 = vpop.xlane.xlu0 %1540 }
 0x400   : > { %v1984_v53 = vpop.f32.mrf.mxu0 }
 0x402   : > { %v1005_v55 = vpop.f32.mrf.mxu0 }
 0x403   : > { %v1012_v57 = vmul.f32 %v2215_v54, %v1005_v55 }
 0x404   : > { %v1995_v58 = vpop.f32.mrf.mxu0 }
 0x405   : > { %1014 = vrot.lane.b32.xlu1 %v1012_v57, %s2529_s5 }
 0x406   : > { %v1008_v59 = vpop.f32.mrf.mxu0 }
 0x407   : > { %v1425_v60 = vpop.xlane.xlu1 %1424 }
 0x408   : > { %v1996_v61 = vpop.f32.mrf.mxu0 }
 0x40a   : > { %v1121_v38 = vpop.f32.mrf.mxu0 }
 0x40b   : > { %v1128_v63 = vmul.f32 %v2217_v62, %v1121_v38  ;;  %v732_v1 = vpop.xlane.xlu1 %731 }
 0x40c   : > { %2218 = vrcp.f32 %v732_v1  ;;  %v2007_v2 = vpop.f32.mrf.mxu0 }
 0x40d   : > { %1130 = vrot.lane.b32.xlu1 %v1128_v63, %s2530_s20  ;;  %2220 = vrcp.f32 %v1193_v56 }
 0x40e   : > { %v1124_v3 = vpop.f32.mrf.mxu0  ;;  %2222 = vrcp.f32 %v1309_v7 }
 0x40f   : > { %2224 = vrcp.f32 %v1425_v60 }
 0x410   : > { %v2008_v4 = vpop.f32.mrf.mxu0  ;;  %2226 = vrcp.f32 %v1541_v15 }
 0x419   : > { %v2219_v5 = vpop.eup %2218 }
 0x41a   : > { %v782_v6 = vmul.f32 %v2219_v5, %v775_v42  ;;  %v2221_v8 = vpop.eup %2220 }
 0x41b   : > { %v2223_v14 = vpop.eup %2222 }
 0x41c   : > { %783 = vst.msk [vmem:[#allocation3] sm:$0xff] %vm676_vm2, %v782_v6  ;;  %v2225_v26 = vpop.eup %2224 }
 0x41d   : > { %v2227_v33 = vpop.eup %2226 }
 0x42f   : > { %v1237_v9 = vpop.f32.mrf.mxu0 }
 0x430   : > { %v1244_v10 = vmul.f32 %v2221_v8, %v1237_v9 }
 0x431   : > { %v2019_v11 = vpop.f32.mrf.mxu0 }
 0x432   : > { %1246 = vrot.lane.b32.xlu0 %v1244_v10, %s2531_s13 }
 0x433   : > { %v1240_v12 = vpop.f32.mrf.mxu0 }
 0x435   : > { %v2020_v13 = vpop.f32.mrf.mxu0 }
 0x437   : > { %v1353_v16 = vpop.f32.mrf.mxu0 }
 0x438   : > { %v1360_v17 = vmul.f32 %v2223_v14, %v1353_v16 }
 0x439   : > { %v2031_v18 = vpop.f32.mrf.mxu0 }
 0x43a   : > { %1362 = vrot.lane.b32.xlu1 %v1360_v17, %s2532_s15 }
 0x43b   : > { %v1356_v19 = vpop.f32.mrf.mxu0 }
 0x43d   : > { %v2032_v20 = vpop.f32.mrf.mxu0 }
 0x43f   : > { %v1469_v27 = vpop.f32.mrf.mxu0 }
 0x440   : > { %v1476_v28 = vmul.f32 %v2225_v26, %v1469_v27 }
 0x441   : > { %v2043_v30 = vpop.f32.mrf.mxu0 }
 0x442   : > { %1478 = vrot.lane.b32.xlu0 %v1476_v28, %s2533_s27 }
 0x443   : > { %v1472_v31 = vpop.f32.mrf.mxu0 }
 0x445   : > { %v2044_v32 = vpop.f32.mrf.mxu0 }
 0x447   : > { %v1585_v34 = vpop.f32.mrf.mxu0 }
 0x448   : > { %v1592_v37 = vmul.f32 %v2227_v33, %v1585_v34 }
 0x449   : > { %v2055_v39 = vpop.f32.mrf.mxu0 }
 0x44a   : > { %1594 = vrot.lane.b32.xlu1 %v1592_v37, %s2534_s24 }
 0x44b   : > { %v1588_v40 = vpop.f32.mrf.mxu0 }
 0x44d   : > { %v2056_v41 = vpop.f32.mrf.mxu0 }
 0x46f   : > { %v899_v0 = vpop.permute.xlu0 %898 }
 0x470   : > { %902 = vst.msk [vmem:[#allocation3] sm:$0xff] %vm901_vm5, %v899_v0 }
 0x477   : > { %v1015_v42 = vpop.permute.xlu1 %1014 }
 0x478   : > { %1018 = vst.msk [vmem:[#allocation3] sm:$0xff] %vm1017_vm6, %v1015_v42 }
 0x47f   : > { %v1131_v43 = vpop.permute.xlu1 %1130 }
 0x480   : > { %1134 = vst.msk [vmem:[#allocation3] sm:$0xff] %vm1133_vm7, %v1131_v43 }
 0x4a4   : > { %v1247_v44 = vpop.permute.xlu0 %1246 }
 0x4a5   : > { %1250 = vst.msk [vmem:[#allocation3] sm:$0xff] %vm1249_vm8, %v1247_v44 }
 0x4ac   : > { %v1363_v45 = vpop.permute.xlu1 %1362 }
 0x4ad   : > { %1366 = vst.msk [vmem:[#allocation3] sm:$0xff] %vm1365_vm9, %v1363_v45 }
 0x4b4   : > { %v1479_v46 = vpop.permute.xlu0 %1478 }
 0x4b5   : > { %1482 = vst.msk [vmem:[#allocation3] sm:$0xff] %vm1481_vm10, %v1479_v46 }
 0x4bc   : > { %v1595_v47 = vpop.permute.xlu1 %1594 }
 0x4bd   : > { %1598 = vst.msk [vmem:[#allocation3] sm:$0xff] %vm1597_vm11, %v1595_v47 }
 0x4c4   : > { %v1600_v48 = vld [vmem:[#allocation3] sm:$0xff] }
 0x4c5   : > { %v1601_v49 = vpack.c.bf16 %v1600_v48, %v1600_v48 }
 0x4c7   : > { %2062 = vmatmul.mubr.msk.bf16.vlgmr.msra.gmra.mxu1 %vm516_vm1, %v1601_v49 }
 0x587   : > { %v1645_v51 = vpop.f32.mrf.mxu1 }
 0x588   : > { %v1651_v52 = vadd.f32 %v1645_v51, %v1599_v50 }
 0x589   : > { %v2063_v35 = vpop.f32.mrf.mxu1 }
 0x58a   : > { %1652 = vst.msk [vmem:[#allocation2] sm:$0xff] %vm516_vm1, %v1651_v52 }
 0x58b   : > { %v1648_v53 = vpop.f32.mrf.mxu1 }
 0x58d   : > { %v2064_v54 = vpop.f32.mrf.mxu1 }
 0x591   : > { %v1656_v55 = vld [vmem:[#allocation2] sm:$0xff] }
 0x592   : > { %1657 = vst.msk [vmem:[%s502_s9] sm:$0xff] %vm516_vm1, %v1656_v55 }
 0x593   : > { %2429 = shalt.err (!%p2426_p4)
}
 0x594   : > { %s2430_s22 = scalar_lea.hbm %s2981_s18, 128  ;;  %s2434_s16 = scalar_lea.hbm %s3032_s8, 256 }
 0x595   : > { %p2431_p8 = scmp.ne.s32.totalorder %s2981_s18, %s2430_s22  ;;  %p2435_p0 = scmp.lt.s32.totalorder %s2981_s18, %s3032_s8 }
 0x596   : > { %p2436_p13 = scmp.lt.s32.totalorder %s2434_s16, %s2430_s22 }
 0x597   : > { %p2432_p6 = pnand %p2431_p8, %p3080_p12 }
 0x598   : > { %p2437_p9 = por %p2436_p13, %p2435_p0 }
 0x599   : > { %p2433_p3 = pneg %p2432_p6 }
 0x59b   : > { %p2438_p11 = pnand %p2437_p9, %p2433_p3 }
 0x59d   : > { %2441 = shalt.err (!%p2438_p11)
}
 0x59e   : > { %2087 = dma.vmem_to_hbm [thread:$0]  (%p3080_p12), %s1674_s12, 128, %s2981_s18, %s1659_s1  }
 0x59f PF: > { %s3081_s13 = sld [smem:[#allocation22_spill]] }
 0x5a0   : > { %s3082_s15 = sld [smem:[#allocation27_spill]] }
 0x5a1   : > { %s3083_s27 = sld [smem:[#allocation24_spill]] }
 0x5a5   : > { %s1685_s17 = sand.u32 1, %s3081_s13  }
 0x5a6   : > { %p3084_p2 = scmp.ne.s32.totalorder %s3082_s15, 0  ;;  %s1686_s19 = scalar_lea.sflag [#allocation6], %s1685_s17 }
 0x5a7   : > { %p3085_p5 = scmp.ge.s32.totalorder %s3083_s27, 2 }
 0x5a9   : > { %p2113_p10 = pnand %p3085_p5, %p3084_p2 }
 0x5ab   : > { %p2114_p1 = pneg %p2113_p10 }
 0x5ad   : > { %2483 = dma.done.wait (%p2114_p1), %s1686_s19, 128  }
 0x5ae   : > { %2485 = vsyncadd (%p2114_p1), %s1686_s19, 4294967168  ;;  %s29_s10 = sadd.s32 1, %s3083_s27   ;;  %s3086_s21 = sld [smem:[#allocation26_spill]] }
 0x5af   : > { %p26_p7 = scmp.ge.s32.totalorder %s29_s10, 4   ;;  %s3087_s30 = sld [smem:[#allocation23_spill]] }
 0x5b0   : > { %s3088_s9 = sld [smem:[#allocation25_spill]]  ;;  %s3089_s27 = smov %s2492_s28 }
 0x5b1   : > { %s3090_s28 = smov %s2496_s29  ;;  %28 = sbr.rel (!%p26_p7) target bundleno = 15 (0xf), region = 149 }
 0x5b4   : > { %s3091_s29 = smov %s3086_s21 }
 0x5b6   :  { %1691 = vsyncpa [#allocation5], 1 }
 0x5b7   :  { %1693 = vsyncpa [#allocation5 + $0x1], 1 }
 0x5b8   :  { %1694 = vsyncpa [#allocation8], 1 }
 0x5b9   :  { %1696 = vsyncpa [#allocation8 + $0x1], 1 }
 0x5ba   :  { %1697 = vsyncpa [#allocation11], 1 }
 0x5bb   :  { %1698 = vsyncpa [#allocation14], 1 }
 0x5bc   :  { %1699 = vsyncpa [#allocation6], 1 }
 0x5bd   :  { %1701 = vsyncpa [#allocation6 + $0x1], 1 }

</bundles_post_ra>
